<compile_context>
chip_gen: v5e
topology: v5e:2x2
jax: 0.10.0
libtpu: 0.0.40
codegen_flags: <defaults>
</compile_context>

<pallas_src>
import math

import jax
import jax.numpy as jnp
from jax.experimental import pallas as pl
from jax.experimental.pallas import tpu as pltpu

HIDDEN = 32
PI = math.pi


def _atan(t):
    # Cephes-style float32 minimax arctangent built from basic VPU ops
    # (mul/add/abs/where) plus EUP approx reciprocals, so it lowers in Mosaic.
    sign = jnp.where(t < 0.0, -1.0, 1.0)
    at = jnp.abs(t)
    tan_pi_8 = 0.41421356237309503
    tan_3pi_8 = 2.414213562373095
    big = at > tan_3pi_8
    mid = jnp.logical_and(at > tan_pi_8, jnp.logical_not(big))
    safe_at = jnp.maximum(at, 1e-30)
    xr = jnp.where(
        big, -pl.reciprocal(safe_at, approx=True),
        jnp.where(mid, (at - 1.0) * pl.reciprocal(at + 1.0, approx=True), at))
    y0 = jnp.where(big, PI / 2.0, jnp.where(mid, PI / 4.0, 0.0))
    z = xr * xr
    poly = (((8.05374449538e-2 * z - 1.38776856032e-1) * z
             + 1.99777106478e-1) * z - 3.33329491539e-1) * z * xr + xr
    return sign * (y0 + poly)


def _atan2(y, x):
    # TODO(synk): swap for jnp.arctan2 once lax.atan2_p lowering is guaranteed
    # in Pallas/Mosaic; this is a float32-accurate, branchless equivalent.
    denom = jnp.where(x == 0.0, 1.0, x)
    a = _atan(y * pl.reciprocal(denom, approx=True))
    neg_x = x < 0.0
    return jnp.where(x > 0.0, a,
           jnp.where(jnp.logical_and(neg_x, y >= 0.0), a + PI,
           jnp.where(jnp.logical_and(neg_x, y < 0.0), a - PI,
           jnp.where(y > 0.0, PI / 2.0,
           jnp.where(y < 0.0, -PI / 2.0, 0.0)))))


def polarnet_kernel(in_ref, w1_ref, b1_ref, w2_ref, b2_ref, out_ref):
    # in_ref: (2, tile_n) VMEM block, lane-dense.  Parameters live in SMEM.
    x = in_ref[0:1, :]          # (1, tile_n) sublane-row slice (effectively free)
    y = in_ref[1:2, :]

    # Cartesian -> polar at full 128-lane width.
    r = jnp.sqrt(x * x + y * y)
    a = _atan2(y, x)

    # Fused linear_1 -> tanh -> linear_2: HIDDEN scalar-broadcast FMAs on the
    # VPU + one tanh each on the EUP.  No (tile_n,32) hidden activation is
    # materialized and the MXU is not touched.
    hidden = w2_ref.shape[0]
    acc = b2_ref[0] + jnp.zeros_like(r)
    for h in range(hidden):     # static unroll (hidden = 32)
        pre = r * w1_ref[0, h] + a * w1_ref[1, h] + b1_ref[h]
        acc = acc + w2_ref[h] * jnp.tanh(pre)

    # sigmoid(z) = 0.5 * (1 + tanh(z/2)): a single EUP op instead of exp + divide.
    out_ref[...] = (0.5 * (jnp.tanh(0.5 * acc) + 1.0)).astype(out_ref.dtype)


def polar_net(inp, w1, b1, w2, b2, *, tile_n=2048):
    """PolarNet forward.  inp: (N, 2) float32 -> (N, 1) sigmoid probabilities."""
    n = inp.shape[0]
    hidden = w1.shape[1]

    # Lane-dense layout: batch on the last (lane) axis, padded to a tile multiple
    # so the grid streams full (2, tile_n) blocks.  Transpose/pad in the wrapper.
    xt = jnp.asarray(inp, jnp.float32).T                         # (2, N)
    n_pad = int(pl.cdiv(n, tile_n)) * tile_n
    if n_pad != n:
        xt = jnp.pad(xt, ((0, 0), (0, n_pad - n)))

    w1f = jnp.asarray(w1, jnp.float32).reshape(2, hidden)
    b1f = jnp.asarray(b1, jnp.float32).reshape(hidden)
    w2f = jnp.asarray(w2, jnp.float32).reshape(hidden)
    b2f = jnp.asarray(b2, jnp.float32).reshape(1)

    smem = pl.BlockSpec(memory_space=pltpu.MemorySpace.SMEM)     # 66 scalars total

    out = pl.pallas_call(
        polarnet_kernel,
        out_shape=jax.ShapeDtypeStruct((1, n_pad), jnp.float32),
        grid=(n_pad // tile_n,),
        in_specs=[
            pl.BlockSpec((2, tile_n), lambda i: (0, i)),         # streamed input
            smem, smem, smem, smem,                              # w1, b1, w2, b2
        ],
        out_specs=pl.BlockSpec((1, tile_n), lambda i: (0, i)),   # lane-dense store
        compiler_params=pltpu.CompilerParams(
            dimension_semantics=("parallel",),   # shard N-tiles across TCs (v7x)
            vmem_limit_bytes=32 * 1024 * 1024,   # explicit (v5e scoped default is 16 MiB)
        ),
    )(xt, w1f, b1f, w2f, b2f)

    return out[0, :n].reshape(n, 1)


if __name__ == "__main__":
    key = jax.random.PRNGKey(0)
    k_in, k_w1, k_b1, k_w2, k_b2 = jax.random.split(key, 5)

    N = 200
    x = jax.random.normal(k_in, (N, 2), dtype=jnp.float32)

    # Deterministic init mimicking torch nn.Linear: U(-1/sqrt(fan_in), 1/sqrt(fan_in)).
    bound1 = 1.0 / math.sqrt(2.0)
    w1 = jax.random.uniform(k_w1, (2, HIDDEN), jnp.float32, -bound1, bound1)
    b1 = jax.random.uniform(k_b1, (HIDDEN,), jnp.float32, -bound1, bound1)
    bound2 = 1.0 / math.sqrt(HIDDEN)
    w2 = jax.random.uniform(k_w2, (HIDDEN, 1), jnp.float32, -bound2, bound2)
    b2 = jax.random.uniform(k_b2, (1,), jnp.float32, -bound2, bound2)

    # Small tile so the test exercises multiple grid steps and lane padding.
    out = jax.block_until_ready(polar_net(x, w1, b1, w2, b2, tile_n=128))

    # Pure-JAX reference of the torch forward.
    r_ref = jnp.sqrt(x[:, 0] ** 2 + x[:, 1] ** 2).reshape(-1, 1)
    a_ref = jnp.arctan2(x[:, 1], x[:, 0]).reshape(-1, 1)
    feat = jnp.concatenate([r_ref, a_ref], axis=1)
    ref = jax.nn.sigmoid(jnp.tanh(feat @ w1 + b1) @ w2 + b2)

    assert out.shape == (N, 1) and out.dtype == jnp.float32
    # 1e-3 tolerance: approx EUP reciprocals in the atan2 path cost a few ULPs
    # vs exact divides; quadrant/semantic bugs would show up as O(0.1) errors.
    assert jnp.allclose(out, ref, atol=1e-3), (out, ref)
    print("KERNEL_OK")
</pallas_src>

<mosaic_0001>
module attributes {stable_mosaic.version = 11 : i64} {
  func.func @polarnet_kernel(%arg0: i32, %arg1: memref<2x128xf32, #tpu.memory_space<vmem>>, %arg2: memref<2x32xf32, #tpu.memory_space<smem>>, %arg3: memref<32xf32, #tpu.memory_space<smem>>, %arg4: memref<32xf32, #tpu.memory_space<smem>>, %arg5: memref<1xf32, #tpu.memory_space<smem>>, %arg6: memref<1x128xf32, #tpu.memory_space<vmem>>) attributes {dimension_semantics = [#tpu.dimension_semantics<parallel>], iteration_bounds = array<i64: 2>, scalar_prefetch = 0 : i64, scratch_operands = 0 : i64, tpu.core_type = #tpu.core_type<tc>, window_params = [{transform_indices = @transform_0, window_bounds = array<i64: 2, 128>}, {transform_indices = @transform_1, window_bounds = array<i64: 2, 32>}, {transform_indices = @transform_2, window_bounds = array<i64: 32>}, {transform_indices = @transform_3, window_bounds = array<i64: 32>}, {transform_indices = @transform_4, window_bounds = array<i64: 1>}, {transform_indices = @transform_5, window_bounds = array<i64: 1, 128>}]} {
    %c0 = arith.constant 0 : index
    %c0_0 = arith.constant 0 : index
    %0 = vector.load %arg1[%c0, %c0_0] : memref<2x128xf32, #tpu.memory_space<vmem>>, vector<1x128xf32>
    %c1 = arith.constant 1 : index
    %c0_1 = arith.constant 0 : index
    %1 = vector.load %arg1[%c1, %c0_1] : memref<2x128xf32, #tpu.memory_space<vmem>>, vector<1x128xf32>
    %2 = arith.mulf %0, %0 : vector<1x128xf32>
    %3 = arith.mulf %1, %1 : vector<1x128xf32>
    %4 = arith.addf %2, %3 : vector<1x128xf32>
    %5 = math.sqrt %4 : vector<1x128xf32>
    %cst = arith.constant 0.000000e+00 : f32
    %6 = vector.broadcast %cst : f32 to vector<1x128xf32>
    %7 = arith.cmpf oeq, %0, %6 : vector<1x128xf32>
    %cst_2 = arith.constant 1.000000e+00 : f32
    %8 = vector.broadcast %cst_2 : f32 to vector<1x128xf32>
    %9 = arith.select %7, %8, %0 : vector<1x128xi1>, vector<1x128xf32>
    %10 = tpu.reciprocal %9 {approx = true} : vector<1x128xf32> -> vector<1x128xf32>
    %11 = arith.mulf %1, %10 : vector<1x128xf32>
    %cst_3 = arith.constant 0.000000e+00 : f32
    %12 = vector.broadcast %cst_3 : f32 to vector<1x128xf32>
    %13 = arith.cmpf olt, %11, %12 : vector<1x128xf32>
    %cst_4 = arith.constant -1.000000e+00 : f32
    %cst_5 = arith.constant 1.000000e+00 : f32
    %14 = vector.broadcast %cst_4 : f32 to vector<1x128xf32>
    %15 = vector.broadcast %cst_5 : f32 to vector<1x128xf32>
    %16 = arith.select %13, %14, %15 : vector<1x128xi1>, vector<1x128xf32>
    %17 = math.absf %11 : vector<1x128xf32>
    %cst_6 = arith.constant 2.41421366 : f32
    %18 = vector.broadcast %cst_6 : f32 to vector<1x128xf32>
    %19 = arith.cmpf ogt, %17, %18 : vector<1x128xf32>
    %cst_7 = arith.constant 0.414213568 : f32
    %20 = vector.broadcast %cst_7 : f32 to vector<1x128xf32>
    %21 = arith.cmpf ogt, %17, %20 : vector<1x128xf32>
    %cst_8 = arith.constant dense<true> : vector<1x128xi1>
    %22 = arith.xori %19, %cst_8 : vector<1x128xi1>
    %23 = arith.andi %21, %22 : vector<1x128xi1>
    %cst_9 = arith.constant 1.000000e-30 : f32
    %24 = vector.broadcast %cst_9 : f32 to vector<1x128xf32>
    %25 = arith.maximumf %17, %24 : vector<1x128xf32>
    %26 = tpu.reciprocal %25 {approx = true} : vector<1x128xf32> -> vector<1x128xf32>
    %cst_10 = arith.constant 0.000000e+00 : f32
    %27 = vector.broadcast %cst_10 : f32 to vector<1x128xf32>
    %28 = arith.subf %27, %26 : vector<1x128xf32>
    %cst_11 = arith.constant 1.000000e+00 : f32
    %29 = vector.broadcast %cst_11 : f32 to vector<1x128xf32>
    %30 = arith.subf %17, %29 : vector<1x128xf32>
    %cst_12 = arith.constant 1.000000e+00 : f32
    %31 = vector.broadcast %cst_12 : f32 to vector<1x128xf32>
    %32 = arith.addf %17, %31 : vector<1x128xf32>
    %33 = tpu.reciprocal %32 {approx = true} : vector<1x128xf32> -> vector<1x128xf32>
    %34 = arith.mulf %30, %33 : vector<1x128xf32>
    %35 = arith.select %23, %34, %17 : vector<1x128xi1>, vector<1x128xf32>
    %36 = arith.select %19, %28, %35 : vector<1x128xi1>, vector<1x128xf32>
    %cst_13 = arith.constant 0.785398185 : f32
    %cst_14 = arith.constant 0.000000e+00 : f32
    %37 = vector.broadcast %cst_13 : f32 to vector<1x128xf32>
    %38 = vector.broadcast %cst_14 : f32 to vector<1x128xf32>
    %39 = arith.select %23, %37, %38 : vector<1x128xi1>, vector<1x128xf32>
    %cst_15 = arith.constant 1.57079637 : f32
    %40 = vector.broadcast %cst_15 : f32 to vector<1x128xf32>
    %41 = arith.select %19, %40, %39 : vector<1x128xi1>, vector<1x128xf32>
    %42 = arith.mulf %36, %36 : vector<1x128xf32>
    %cst_16 = arith.constant 0.0805374458 : f32
    %43 = vector.broadcast %cst_16 : f32 to vector<1x128xf32>
    %44 = arith.mulf %43, %42 : vector<1x128xf32>
    %cst_17 = arith.constant 0.138776854 : f32
    %45 = vector.broadcast %cst_17 : f32 to vector<1x128xf32>
    %46 = arith.subf %44, %45 : vector<1x128xf32>
    %47 = arith.mulf %46, %42 : vector<1x128xf32>
    %cst_18 = arith.constant 0.199777111 : f32
    %48 = vector.broadcast %cst_18 : f32 to vector<1x128xf32>
    %49 = arith.addf %47, %48 : vector<1x128xf32>
    %50 = arith.mulf %49, %42 : vector<1x128xf32>
    %cst_19 = arith.constant 0.333329499 : f32
    %51 = vector.broadcast %cst_19 : f32 to vector<1x128xf32>
    %52 = arith.subf %50, %51 : vector<1x128xf32>
    %53 = arith.mulf %52, %42 : vector<1x128xf32>
    %54 = arith.mulf %53, %36 : vector<1x128xf32>
    %55 = arith.addf %54, %36 : vector<1x128xf32>
    %56 = arith.addf %41, %55 : vector<1x128xf32>
    %57 = arith.mulf %16, %56 : vector<1x128xf32>
    %cst_20 = arith.constant 0.000000e+00 : f32
    %58 = vector.broadcast %cst_20 : f32 to vector<1x128xf32>
    %59 = arith.cmpf olt, %0, %58 : vector<1x128xf32>
    %cst_21 = arith.constant 0.000000e+00 : f32
    %60 = vector.broadcast %cst_21 : f32 to vector<1x128xf32>
    %61 = arith.cmpf ogt, %0, %60 : vector<1x128xf32>
    %cst_22 = arith.constant 0.000000e+00 : f32
    %62 = vector.broadcast %cst_22 : f32 to vector<1x128xf32>
    %63 = arith.cmpf oge, %1, %62 : vector<1x128xf32>
    %64 = arith.andi %59, %63 : vector<1x128xi1>
    %cst_23 = arith.constant 3.14159274 : f32
    %65 = vector.broadcast %cst_23 : f32 to vector<1x128xf32>
    %66 = arith.addf %57, %65 : vector<1x128xf32>
    %cst_24 = arith.constant 0.000000e+00 : f32
    %67 = vector.broadcast %cst_24 : f32 to vector<1x128xf32>
    %68 = arith.cmpf olt, %1, %67 : vector<1x128xf32>
    %69 = arith.andi %59, %68 : vector<1x128xi1>
    %cst_25 = arith.constant 3.14159274 : f32
    %70 = vector.broadcast %cst_25 : f32 to vector<1x128xf32>
    %71 = arith.subf %57, %70 : vector<1x128xf32>
    %cst_26 = arith.constant 0.000000e+00 : f32
    %72 = vector.broadcast %cst_26 : f32 to vector<1x128xf32>
    %73 = arith.cmpf ogt, %1, %72 : vector<1x128xf32>
    %cst_27 = arith.constant 0.000000e+00 : f32
    %74 = vector.broadcast %cst_27 : f32 to vector<1x128xf32>
    %75 = arith.cmpf olt, %1, %74 : vector<1x128xf32>
    %cst_28 = arith.constant -1.57079637 : f32
    %cst_29 = arith.constant 0.000000e+00 : f32
    %76 = vector.broadcast %cst_28 : f32 to vector<1x128xf32>
    %77 = vector.broadcast %cst_29 : f32 to vector<1x128xf32>
    %78 = arith.select %75, %76, %77 : vector<1x128xi1>, vector<1x128xf32>
    %cst_30 = arith.constant 1.57079637 : f32
    %79 = vector.broadcast %cst_30 : f32 to vector<1x128xf32>
    %80 = arith.select %73, %79, %78 : vector<1x128xi1>, vector<1x128xf32>
    %81 = arith.select %69, %71, %80 : vector<1x128xi1>, vector<1x128xf32>
    %82 = arith.select %64, %66, %81 : vector<1x128xi1>, vector<1x128xf32>
    %83 = arith.select %61, %57, %82 : vector<1x128xi1>, vector<1x128xf32>
    %c0_31 = arith.constant 0 : index
    %84 = memref.load %arg5[%c0_31] : memref<1xf32, #tpu.memory_space<smem>>
    %cst_32 = arith.constant 0.000000e+00 : f32
    %85 = vector.broadcast %cst_32 : f32 to vector<1x128xf32>
    %86 = vector.broadcast %84 : f32 to vector<1x128xf32>
    %87 = arith.addf %86, %85 : vector<1x128xf32>
    %c0_33 = arith.constant 0 : index
    %c0_34 = arith.constant 0 : index
    %88 = memref.load %arg2[%c0_33, %c0_34] : memref<2x32xf32, #tpu.memory_space<smem>>
    %89 = vector.broadcast %88 : f32 to vector<1x128xf32>
    %90 = arith.mulf %5, %89 : vector<1x128xf32>
    %c1_35 = arith.constant 1 : index
    %c0_36 = arith.constant 0 : index
    %91 = memref.load %arg2[%c1_35, %c0_36] : memref<2x32xf32, #tpu.memory_space<smem>>
    %92 = vector.broadcast %91 : f32 to vector<1x128xf32>
    %93 = arith.mulf %83, %92 : vector<1x128xf32>
    %94 = arith.addf %90, %93 : vector<1x128xf32>
    %c0_37 = arith.constant 0 : index
    %95 = memref.load %arg3[%c0_37] : memref<32xf32, #tpu.memory_space<smem>>
    %96 = vector.broadcast %95 : f32 to vector<1x128xf32>
    %97 = arith.addf %94, %96 : vector<1x128xf32>
    %c0_38 = arith.constant 0 : index
    %98 = memref.load %arg4[%c0_38] : memref<32xf32, #tpu.memory_space<smem>>
    %99 = math.tanh %97 : vector<1x128xf32>
    %100 = vector.broadcast %98 : f32 to vector<1x128xf32>
    %101 = arith.mulf %100, %99 : vector<1x128xf32>
    %102 = arith.addf %87, %101 : vector<1x128xf32>
    %c0_39 = arith.constant 0 : index
    %c1_40 = arith.constant 1 : index
    %103 = memref.load %arg2[%c0_39, %c1_40] : memref<2x32xf32, #tpu.memory_space<smem>>
    %104 = vector.broadcast %103 : f32 to vector<1x128xf32>
    %105 = arith.mulf %5, %104 : vector<1x128xf32>
    %c1_41 = arith.constant 1 : index
    %c1_42 = arith.constant 1 : index
    %106 = memref.load %arg2[%c1_41, %c1_42] : memref<2x32xf32, #tpu.memory_space<smem>>
    %107 = vector.broadcast %106 : f32 to vector<1x128xf32>
    %108 = arith.mulf %83, %107 : vector<1x128xf32>
    %109 = arith.addf %105, %108 : vector<1x128xf32>
    %c1_43 = arith.constant 1 : index
    %110 = memref.load %arg3[%c1_43] : memref<32xf32, #tpu.memory_space<smem>>
    %111 = vector.broadcast %110 : f32 to vector<1x128xf32>
    %112 = arith.addf %109, %111 : vector<1x128xf32>
    %c1_44 = arith.constant 1 : index
    %113 = memref.load %arg4[%c1_44] : memref<32xf32, #tpu.memory_space<smem>>
    %114 = math.tanh %112 : vector<1x128xf32>
    %115 = vector.broadcast %113 : f32 to vector<1x128xf32>
    %116 = arith.mulf %115, %114 : vector<1x128xf32>
    %117 = arith.addf %102, %116 : vector<1x128xf32>
    %c0_45 = arith.constant 0 : index
    %c2 = arith.constant 2 : index
    %118 = memref.load %arg2[%c0_45, %c2] : memref<2x32xf32, #tpu.memory_space<smem>>
    %119 = vector.broadcast %118 : f32 to vector<1x128xf32>
    %120 = arith.mulf %5, %119 : vector<1x128xf32>
    %c1_46 = arith.constant 1 : index
    %c2_47 = arith.constant 2 : index
    %121 = memref.load %arg2[%c1_46, %c2_47] : memref<2x32xf32, #tpu.memory_space<smem>>
    %122 = vector.broadcast %121 : f32 to vector<1x128xf32>
    %123 = arith.mulf %83, %122 : vector<1x128xf32>
    %124 = arith.addf %120, %123 : vector<1x128xf32>
    %c2_48 = arith.constant 2 : index
    %125 = memref.load %arg3[%c2_48] : memref<32xf32, #tpu.memory_space<smem>>
    %126 = vector.broadcast %125 : f32 to vector<1x128xf32>
    %127 = arith.addf %124, %126 : vector<1x128xf32>
    %c2_49 = arith.constant 2 : index
    %128 = memref.load %arg4[%c2_49] : memref<32xf32, #tpu.memory_space<smem>>
    %129 = math.tanh %127 : vector<1x128xf32>
    %130 = vector.broadcast %128 : f32 to vector<1x128xf32>
    %131 = arith.mulf %130, %129 : vector<1x128xf32>
    %132 = arith.addf %117, %131 : vector<1x128xf32>
    %c0_50 = arith.constant 0 : index
    %c3 = arith.constant 3 : index
    %133 = memref.load %arg2[%c0_50, %c3] : memref<2x32xf32, #tpu.memory_space<smem>>
    %134 = vector.broadcast %133 : f32 to vector<1x128xf32>
    %135 = arith.mulf %5, %134 : vector<1x128xf32>
    %c1_51 = arith.constant 1 : index
    %c3_52 = arith.constant 3 : index
    %136 = memref.load %arg2[%c1_51, %c3_52] : memref<2x32xf32, #tpu.memory_space<smem>>
    %137 = vector.broadcast %136 : f32 to vector<1x128xf32>
    %138 = arith.mulf %83, %137 : vector<1x128xf32>
    %139 = arith.addf %135, %138 : vector<1x128xf32>
    %c3_53 = arith.constant 3 : index
    %140 = memref.load %arg3[%c3_53] : memref<32xf32, #tpu.memory_space<smem>>
    %141 = vector.broadcast %140 : f32 to vector<1x128xf32>
    %142 = arith.addf %139, %141 : vector<1x128xf32>
    %c3_54 = arith.constant 3 : index
    %143 = memref.load %arg4[%c3_54] : memref<32xf32, #tpu.memory_space<smem>>
    %144 = math.tanh %142 : vector<1x128xf32>
    %145 = vector.broadcast %143 : f32 to vector<1x128xf32>
    %146 = arith.mulf %145, %144 : vector<1x128xf32>
    %147 = arith.addf %132, %146 : vector<1x128xf32>
    %c0_55 = arith.constant 0 : index
    %c4 = arith.constant 4 : index
    %148 = memref.load %arg2[%c0_55, %c4] : memref<2x32xf32, #tpu.memory_space<smem>>
    %149 = vector.broadcast %148 : f32 to vector<1x128xf32>
    %150 = arith.mulf %5, %149 : vector<1x128xf32>
    %c1_56 = arith.constant 1 : index
    %c4_57 = arith.constant 4 : index
    %151 = memref.load %arg2[%c1_56, %c4_57] : memref<2x32xf32, #tpu.memory_space<smem>>
    %152 = vector.broadcast %151 : f32 to vector<1x128xf32>
    %153 = arith.mulf %83, %152 : vector<1x128xf32>
    %154 = arith.addf %150, %153 : vector<1x128xf32>
    %c4_58 = arith.constant 4 : index
    %155 = memref.load %arg3[%c4_58] : memref<32xf32, #tpu.memory_space<smem>>
    %156 = vector.broadcast %155 : f32 to vector<1x128xf32>
    %157 = arith.addf %154, %156 : vector<1x128xf32>
    %c4_59 = arith.constant 4 : index
    %158 = memref.load %arg4[%c4_59] : memref<32xf32, #tpu.memory_space<smem>>
    %159 = math.tanh %157 : vector<1x128xf32>
    %160 = vector.broadcast %158 : f32 to vector<1x128xf32>
    %161 = arith.mulf %160, %159 : vector<1x128xf32>
    %162 = arith.addf %147, %161 : vector<1x128xf32>
    %c0_60 = arith.constant 0 : index
    %c5 = arith.constant 5 : index
    %163 = memref.load %arg2[%c0_60, %c5] : memref<2x32xf32, #tpu.memory_space<smem>>
    %164 = vector.broadcast %163 : f32 to vector<1x128xf32>
    %165 = arith.mulf %5, %164 : vector<1x128xf32>
    %c1_61 = arith.constant 1 : index
    %c5_62 = arith.constant 5 : index
    %166 = memref.load %arg2[%c1_61, %c5_62] : memref<2x32xf32, #tpu.memory_space<smem>>
    %167 = vector.broadcast %166 : f32 to vector<1x128xf32>
    %168 = arith.mulf %83, %167 : vector<1x128xf32>
    %169 = arith.addf %165, %168 : vector<1x128xf32>
    %c5_63 = arith.constant 5 : index
    %170 = memref.load %arg3[%c5_63] : memref<32xf32, #tpu.memory_space<smem>>
    %171 = vector.broadcast %170 : f32 to vector<1x128xf32>
    %172 = arith.addf %169, %171 : vector<1x128xf32>
    %c5_64 = arith.constant 5 : index
    %173 = memref.load %arg4[%c5_64] : memref<32xf32, #tpu.memory_space<smem>>
    %174 = math.tanh %172 : vector<1x128xf32>
    %175 = vector.broadcast %173 : f32 to vector<1x128xf32>
    %176 = arith.mulf %175, %174 : vector<1x128xf32>
    %177 = arith.addf %162, %176 : vector<1x128xf32>
    %c0_65 = arith.constant 0 : index
    %c6 = arith.constant 6 : index
    %178 = memref.load %arg2[%c0_65, %c6] : memref<2x32xf32, #tpu.memory_space<smem>>
    %179 = vector.broadcast %178 : f32 to vector<1x128xf32>
    %180 = arith.mulf %5, %179 : vector<1x128xf32>
    %c1_66 = arith.constant 1 : index
    %c6_67 = arith.constant 6 : index
    %181 = memref.load %arg2[%c1_66, %c6_67] : memref<2x32xf32, #tpu.memory_space<smem>>
    %182 = vector.broadcast %181 : f32 to vector<1x128xf32>
    %183 = arith.mulf %83, %182 : vector<1x128xf32>
    %184 = arith.addf %180, %183 : vector<1x128xf32>
    %c6_68 = arith.constant 6 : index
    %185 = memref.load %arg3[%c6_68] : memref<32xf32, #tpu.memory_space<smem>>
    %186 = vector.broadcast %185 : f32 to vector<1x128xf32>
    %187 = arith.addf %184, %186 : vector<1x128xf32>
    %c6_69 = arith.constant 6 : index
    %188 = memref.load %arg4[%c6_69] : memref<32xf32, #tpu.memory_space<smem>>
    %189 = math.tanh %187 : vector<1x128xf32>
    %190 = vector.broadcast %188 : f32 to vector<1x128xf32>
    %191 = arith.mulf %190, %189 : vector<1x128xf32>
    %192 = arith.addf %177, %191 : vector<1x128xf32>
    %c0_70 = arith.constant 0 : index
    %c7 = arith.constant 7 : index
    %193 = memref.load %arg2[%c0_70, %c7] : memref<2x32xf32, #tpu.memory_space<smem>>
    %194 = vector.broadcast %193 : f32 to vector<1x128xf32>
    %195 = arith.mulf %5, %194 : vector<1x128xf32>
    %c1_71 = arith.constant 1 : index
    %c7_72 = arith.constant 7 : index
    %196 = memref.load %arg2[%c1_71, %c7_72] : memref<2x32xf32, #tpu.memory_space<smem>>
    %197 = vector.broadcast %196 : f32 to vector<1x128xf32>
    %198 = arith.mulf %83, %197 : vector<1x128xf32>
    %199 = arith.addf %195, %198 : vector<1x128xf32>
    %c7_73 = arith.constant 7 : index
    %200 = memref.load %arg3[%c7_73] : memref<32xf32, #tpu.memory_space<smem>>
    %201 = vector.broadcast %200 : f32 to vector<1x128xf32>
    %202 = arith.addf %199, %201 : vector<1x128xf32>
    %c7_74 = arith.constant 7 : index
    %203 = memref.load %arg4[%c7_74] : memref<32xf32, #tpu.memory_space<smem>>
    %204 = math.tanh %202 : vector<1x128xf32>
    %205 = vector.broadcast %203 : f32 to vector<1x128xf32>
    %206 = arith.mulf %205, %204 : vector<1x128xf32>
    %207 = arith.addf %192, %206 : vector<1x128xf32>
    %c0_75 = arith.constant 0 : index
    %c8 = arith.constant 8 : index
    %208 = memref.load %arg2[%c0_75, %c8] : memref<2x32xf32, #tpu.memory_space<smem>>
    %209 = vector.broadcast %208 : f32 to vector<1x128xf32>
    %210 = arith.mulf %5, %209 : vector<1x128xf32>
    %c1_76 = arith.constant 1 : index
    %c8_77 = arith.constant 8 : index
    %211 = memref.load %arg2[%c1_76, %c8_77] : memref<2x32xf32, #tpu.memory_space<smem>>
    %212 = vector.broadcast %211 : f32 to vector<1x128xf32>
    %213 = arith.mulf %83, %212 : vector<1x128xf32>
    %214 = arith.addf %210, %213 : vector<1x128xf32>
    %c8_78 = arith.constant 8 : index
    %215 = memref.load %arg3[%c8_78] : memref<32xf32, #tpu.memory_space<smem>>
    %216 = vector.broadcast %215 : f32 to vector<1x128xf32>
    %217 = arith.addf %214, %216 : vector<1x128xf32>
    %c8_79 = arith.constant 8 : index
    %218 = memref.load %arg4[%c8_79] : memref<32xf32, #tpu.memory_space<smem>>
    %219 = math.tanh %217 : vector<1x128xf32>
    %220 = vector.broadcast %218 : f32 to vector<1x128xf32>
    %221 = arith.mulf %220, %219 : vector<1x128xf32>
    %222 = arith.addf %207, %221 : vector<1x128xf32>
    %c0_80 = arith.constant 0 : index
    %c9 = arith.constant 9 : index
    %223 = memref.load %arg2[%c0_80, %c9] : memref<2x32xf32, #tpu.memory_space<smem>>
    %224 = vector.broadcast %223 : f32 to vector<1x128xf32>
    %225 = arith.mulf %5, %224 : vector<1x128xf32>
    %c1_81 = arith.constant 1 : index
    %c9_82 = arith.constant 9 : index
    %226 = memref.load %arg2[%c1_81, %c9_82] : memref<2x32xf32, #tpu.memory_space<smem>>
    %227 = vector.broadcast %226 : f32 to vector<1x128xf32>
    %228 = arith.mulf %83, %227 : vector<1x128xf32>
    %229 = arith.addf %225, %228 : vector<1x128xf32>
    %c9_83 = arith.constant 9 : index
    %230 = memref.load %arg3[%c9_83] : memref<32xf32, #tpu.memory_space<smem>>
    %231 = vector.broadcast %230 : f32 to vector<1x128xf32>
    %232 = arith.addf %229, %231 : vector<1x128xf32>
    %c9_84 = arith.constant 9 : index
    %233 = memref.load %arg4[%c9_84] : memref<32xf32, #tpu.memory_space<smem>>
    %234 = math.tanh %232 : vector<1x128xf32>
    %235 = vector.broadcast %233 : f32 to vector<1x128xf32>
    %236 = arith.mulf %235, %234 : vector<1x128xf32>
    %237 = arith.addf %222, %236 : vector<1x128xf32>
    %c0_85 = arith.constant 0 : index
    %c10 = arith.constant 10 : index
    %238 = memref.load %arg2[%c0_85, %c10] : memref<2x32xf32, #tpu.memory_space<smem>>
    %239 = vector.broadcast %238 : f32 to vector<1x128xf32>
    %240 = arith.mulf %5, %239 : vector<1x128xf32>
    %c1_86 = arith.constant 1 : index
    %c10_87 = arith.constant 10 : index
    %241 = memref.load %arg2[%c1_86, %c10_87] : memref<2x32xf32, #tpu.memory_space<smem>>
    %242 = vector.broadcast %241 : f32 to vector<1x128xf32>
    %243 = arith.mulf %83, %242 : vector<1x128xf32>
    %244 = arith.addf %240, %243 : vector<1x128xf32>
    %c10_88 = arith.constant 10 : index
    %245 = memref.load %arg3[%c10_88] : memref<32xf32, #tpu.memory_space<smem>>
    %246 = vector.broadcast %245 : f32 to vector<1x128xf32>
    %247 = arith.addf %244, %246 : vector<1x128xf32>
    %c10_89 = arith.constant 10 : index
    %248 = memref.load %arg4[%c10_89] : memref<32xf32, #tpu.memory_space<smem>>
    %249 = math.tanh %247 : vector<1x128xf32>
    %250 = vector.broadcast %248 : f32 to vector<1x128xf32>
    %251 = arith.mulf %250, %249 : vector<1x128xf32>
    %252 = arith.addf %237, %251 : vector<1x128xf32>
    %c0_90 = arith.constant 0 : index
    %c11 = arith.constant 11 : index
    %253 = memref.load %arg2[%c0_90, %c11] : memref<2x32xf32, #tpu.memory_space<smem>>
    %254 = vector.broadcast %253 : f32 to vector<1x128xf32>
    %255 = arith.mulf %5, %254 : vector<1x128xf32>
    %c1_91 = arith.constant 1 : index
    %c11_92 = arith.constant 11 : index
    %256 = memref.load %arg2[%c1_91, %c11_92] : memref<2x32xf32, #tpu.memory_space<smem>>
    %257 = vector.broadcast %256 : f32 to vector<1x128xf32>
    %258 = arith.mulf %83, %257 : vector<1x128xf32>
    %259 = arith.addf %255, %258 : vector<1x128xf32>
    %c11_93 = arith.constant 11 : index
    %260 = memref.load %arg3[%c11_93] : memref<32xf32, #tpu.memory_space<smem>>
    %261 = vector.broadcast %260 : f32 to vector<1x128xf32>
    %262 = arith.addf %259, %261 : vector<1x128xf32>
    %c11_94 = arith.constant 11 : index
    %263 = memref.load %arg4[%c11_94] : memref<32xf32, #tpu.memory_space<smem>>
    %264 = math.tanh %262 : vector<1x128xf32>
    %265 = vector.broadcast %263 : f32 to vector<1x128xf32>
    %266 = arith.mulf %265, %264 : vector<1x128xf32>
    %267 = arith.addf %252, %266 : vector<1x128xf32>
    %c0_95 = arith.constant 0 : index
    %c12 = arith.constant 12 : index
    %268 = memref.load %arg2[%c0_95, %c12] : memref<2x32xf32, #tpu.memory_space<smem>>
    %269 = vector.broadcast %268 : f32 to vector<1x128xf32>
    %270 = arith.mulf %5, %269 : vector<1x128xf32>
    %c1_96 = arith.constant 1 : index
    %c12_97 = arith.constant 12 : index
    %271 = memref.load %arg2[%c1_96, %c12_97] : memref<2x32xf32, #tpu.memory_space<smem>>
    %272 = vector.broadcast %271 : f32 to vector<1x128xf32>
    %273 = arith.mulf %83, %272 : vector<1x128xf32>
    %274 = arith.addf %270, %273 : vector<1x128xf32>
    %c12_98 = arith.constant 12 : index
    %275 = memref.load %arg3[%c12_98] : memref<32xf32, #tpu.memory_space<smem>>
    %276 = vector.broadcast %275 : f32 to vector<1x128xf32>
    %277 = arith.addf %274, %276 : vector<1x128xf32>
    %c12_99 = arith.constant 12 : index
    %278 = memref.load %arg4[%c12_99] : memref<32xf32, #tpu.memory_space<smem>>
    %279 = math.tanh %277 : vector<1x128xf32>
    %280 = vector.broadcast %278 : f32 to vector<1x128xf32>
    %281 = arith.mulf %280, %279 : vector<1x128xf32>
    %282 = arith.addf %267, %281 : vector<1x128xf32>
    %c0_100 = arith.constant 0 : index
    %c13 = arith.constant 13 : index
    %283 = memref.load %arg2[%c0_100, %c13] : memref<2x32xf32, #tpu.memory_space<smem>>
    %284 = vector.broadcast %283 : f32 to vector<1x128xf32>
    %285 = arith.mulf %5, %284 : vector<1x128xf32>
    %c1_101 = arith.constant 1 : index
    %c13_102 = arith.constant 13 : index
    %286 = memref.load %arg2[%c1_101, %c13_102] : memref<2x32xf32, #tpu.memory_space<smem>>
    %287 = vector.broadcast %286 : f32 to vector<1x128xf32>
    %288 = arith.mulf %83, %287 : vector<1x128xf32>
    %289 = arith.addf %285, %288 : vector<1x128xf32>
    %c13_103 = arith.constant 13 : index
    %290 = memref.load %arg3[%c13_103] : memref<32xf32, #tpu.memory_space<smem>>
    %291 = vector.broadcast %290 : f32 to vector<1x128xf32>
    %292 = arith.addf %289, %291 : vector<1x128xf32>
    %c13_104 = arith.constant 13 : index
    %293 = memref.load %arg4[%c13_104] : memref<32xf32, #tpu.memory_space<smem>>
    %294 = math.tanh %292 : vector<1x128xf32>
    %295 = vector.broadcast %293 : f32 to vector<1x128xf32>
    %296 = arith.mulf %295, %294 : vector<1x128xf32>
    %297 = arith.addf %282, %296 : vector<1x128xf32>
    %c0_105 = arith.constant 0 : index
    %c14 = arith.constant 14 : index
    %298 = memref.load %arg2[%c0_105, %c14] : memref<2x32xf32, #tpu.memory_space<smem>>
    %299 = vector.broadcast %298 : f32 to vector<1x128xf32>
    %300 = arith.mulf %5, %299 : vector<1x128xf32>
    %c1_106 = arith.constant 1 : index
    %c14_107 = arith.constant 14 : index
    %301 = memref.load %arg2[%c1_106, %c14_107] : memref<2x32xf32, #tpu.memory_space<smem>>
    %302 = vector.broadcast %301 : f32 to vector<1x128xf32>
    %303 = arith.mulf %83, %302 : vector<1x128xf32>
    %304 = arith.addf %300, %303 : vector<1x128xf32>
    %c14_108 = arith.constant 14 : index
    %305 = memref.load %arg3[%c14_108] : memref<32xf32, #tpu.memory_space<smem>>
    %306 = vector.broadcast %305 : f32 to vector<1x128xf32>
    %307 = arith.addf %304, %306 : vector<1x128xf32>
    %c14_109 = arith.constant 14 : index
    %308 = memref.load %arg4[%c14_109] : memref<32xf32, #tpu.memory_space<smem>>
    %309 = math.tanh %307 : vector<1x128xf32>
    %310 = vector.broadcast %308 : f32 to vector<1x128xf32>
    %311 = arith.mulf %310, %309 : vector<1x128xf32>
    %312 = arith.addf %297, %311 : vector<1x128xf32>
    %c0_110 = arith.constant 0 : index
    %c15 = arith.constant 15 : index
    %313 = memref.load %arg2[%c0_110, %c15] : memref<2x32xf32, #tpu.memory_space<smem>>
    %314 = vector.broadcast %313 : f32 to vector<1x128xf32>
    %315 = arith.mulf %5, %314 : vector<1x128xf32>
    %c1_111 = arith.constant 1 : index
    %c15_112 = arith.constant 15 : index
    %316 = memref.load %arg2[%c1_111, %c15_112] : memref<2x32xf32, #tpu.memory_space<smem>>
    %317 = vector.broadcast %316 : f32 to vector<1x128xf32>
    %318 = arith.mulf %83, %317 : vector<1x128xf32>
    %319 = arith.addf %315, %318 : vector<1x128xf32>
    %c15_113 = arith.constant 15 : index
    %320 = memref.load %arg3[%c15_113] : memref<32xf32, #tpu.memory_space<smem>>
    %321 = vector.broadcast %320 : f32 to vector<1x128xf32>
    %322 = arith.addf %319, %321 : vector<1x128xf32>
    %c15_114 = arith.constant 15 : index
    %323 = memref.load %arg4[%c15_114] : memref<32xf32, #tpu.memory_space<smem>>
    %324 = math.tanh %322 : vector<1x128xf32>
    %325 = vector.broadcast %323 : f32 to vector<1x128xf32>
    %326 = arith.mulf %325, %324 : vector<1x128xf32>
    %327 = arith.addf %312, %326 : vector<1x128xf32>
    %c0_115 = arith.constant 0 : index
    %c16 = arith.constant 16 : index
    %328 = memref.load %arg2[%c0_115, %c16] : memref<2x32xf32, #tpu.memory_space<smem>>
    %329 = vector.broadcast %328 : f32 to vector<1x128xf32>
    %330 = arith.mulf %5, %329 : vector<1x128xf32>
    %c1_116 = arith.constant 1 : index
    %c16_117 = arith.constant 16 : index
    %331 = memref.load %arg2[%c1_116, %c16_117] : memref<2x32xf32, #tpu.memory_space<smem>>
    %332 = vector.broadcast %331 : f32 to vector<1x128xf32>
    %333 = arith.mulf %83, %332 : vector<1x128xf32>
    %334 = arith.addf %330, %333 : vector<1x128xf32>
    %c16_118 = arith.constant 16 : index
    %335 = memref.load %arg3[%c16_118] : memref<32xf32, #tpu.memory_space<smem>>
    %336 = vector.broadcast %335 : f32 to vector<1x128xf32>
    %337 = arith.addf %334, %336 : vector<1x128xf32>
    %c16_119 = arith.constant 16 : index
    %338 = memref.load %arg4[%c16_119] : memref<32xf32, #tpu.memory_space<smem>>
    %339 = math.tanh %337 : vector<1x128xf32>
    %340 = vector.broadcast %338 : f32 to vector<1x128xf32>
    %341 = arith.mulf %340, %339 : vector<1x128xf32>
    %342 = arith.addf %327, %341 : vector<1x128xf32>
    %c0_120 = arith.constant 0 : index
    %c17 = arith.constant 17 : index
    %343 = memref.load %arg2[%c0_120, %c17] : memref<2x32xf32, #tpu.memory_space<smem>>
    %344 = vector.broadcast %343 : f32 to vector<1x128xf32>
    %345 = arith.mulf %5, %344 : vector<1x128xf32>
    %c1_121 = arith.constant 1 : index
    %c17_122 = arith.constant 17 : index
    %346 = memref.load %arg2[%c1_121, %c17_122] : memref<2x32xf32, #tpu.memory_space<smem>>
    %347 = vector.broadcast %346 : f32 to vector<1x128xf32>
    %348 = arith.mulf %83, %347 : vector<1x128xf32>
    %349 = arith.addf %345, %348 : vector<1x128xf32>
    %c17_123 = arith.constant 17 : index
    %350 = memref.load %arg3[%c17_123] : memref<32xf32, #tpu.memory_space<smem>>
    %351 = vector.broadcast %350 : f32 to vector<1x128xf32>
    %352 = arith.addf %349, %351 : vector<1x128xf32>
    %c17_124 = arith.constant 17 : index
    %353 = memref.load %arg4[%c17_124] : memref<32xf32, #tpu.memory_space<smem>>
    %354 = math.tanh %352 : vector<1x128xf32>
    %355 = vector.broadcast %353 : f32 to vector<1x128xf32>
    %356 = arith.mulf %355, %354 : vector<1x128xf32>
    %357 = arith.addf %342, %356 : vector<1x128xf32>
    %c0_125 = arith.constant 0 : index
    %c18 = arith.constant 18 : index
    %358 = memref.load %arg2[%c0_125, %c18] : memref<2x32xf32, #tpu.memory_space<smem>>
    %359 = vector.broadcast %358 : f32 to vector<1x128xf32>
    %360 = arith.mulf %5, %359 : vector<1x128xf32>
    %c1_126 = arith.constant 1 : index
    %c18_127 = arith.constant 18 : index
    %361 = memref.load %arg2[%c1_126, %c18_127] : memref<2x32xf32, #tpu.memory_space<smem>>
    %362 = vector.broadcast %361 : f32 to vector<1x128xf32>
    %363 = arith.mulf %83, %362 : vector<1x128xf32>
    %364 = arith.addf %360, %363 : vector<1x128xf32>
    %c18_128 = arith.constant 18 : index
    %365 = memref.load %arg3[%c18_128] : memref<32xf32, #tpu.memory_space<smem>>
    %366 = vector.broadcast %365 : f32 to vector<1x128xf32>
    %367 = arith.addf %364, %366 : vector<1x128xf32>
    %c18_129 = arith.constant 18 : index
    %368 = memref.load %arg4[%c18_129] : memref<32xf32, #tpu.memory_space<smem>>
    %369 = math.tanh %367 : vector<1x128xf32>
    %370 = vector.broadcast %368 : f32 to vector<1x128xf32>
    %371 = arith.mulf %370, %369 : vector<1x128xf32>
    %372 = arith.addf %357, %371 : vector<1x128xf32>
    %c0_130 = arith.constant 0 : index
    %c19 = arith.constant 19 : index
    %373 = memref.load %arg2[%c0_130, %c19] : memref<2x32xf32, #tpu.memory_space<smem>>
    %374 = vector.broadcast %373 : f32 to vector<1x128xf32>
    %375 = arith.mulf %5, %374 : vector<1x128xf32>
    %c1_131 = arith.constant 1 : index
    %c19_132 = arith.constant 19 : index
    %376 = memref.load %arg2[%c1_131, %c19_132] : memref<2x32xf32, #tpu.memory_space<smem>>
    %377 = vector.broadcast %376 : f32 to vector<1x128xf32>
    %378 = arith.mulf %83, %377 : vector<1x128xf32>
    %379 = arith.addf %375, %378 : vector<1x128xf32>
    %c19_133 = arith.constant 19 : index
    %380 = memref.load %arg3[%c19_133] : memref<32xf32, #tpu.memory_space<smem>>
    %381 = vector.broadcast %380 : f32 to vector<1x128xf32>
    %382 = arith.addf %379, %381 : vector<1x128xf32>
    %c19_134 = arith.constant 19 : index
    %383 = memref.load %arg4[%c19_134] : memref<32xf32, #tpu.memory_space<smem>>
    %384 = math.tanh %382 : vector<1x128xf32>
    %385 = vector.broadcast %383 : f32 to vector<1x128xf32>
    %386 = arith.mulf %385, %384 : vector<1x128xf32>
    %387 = arith.addf %372, %386 : vector<1x128xf32>
    %c0_135 = arith.constant 0 : index
    %c20 = arith.constant 20 : index
    %388 = memref.load %arg2[%c0_135, %c20] : memref<2x32xf32, #tpu.memory_space<smem>>
    %389 = vector.broadcast %388 : f32 to vector<1x128xf32>
    %390 = arith.mulf %5, %389 : vector<1x128xf32>
    %c1_136 = arith.constant 1 : index
    %c20_137 = arith.constant 20 : index
    %391 = memref.load %arg2[%c1_136, %c20_137] : memref<2x32xf32, #tpu.memory_space<smem>>
    %392 = vector.broadcast %391 : f32 to vector<1x128xf32>
    %393 = arith.mulf %83, %392 : vector<1x128xf32>
    %394 = arith.addf %390, %393 : vector<1x128xf32>
    %c20_138 = arith.constant 20 : index
    %395 = memref.load %arg3[%c20_138] : memref<32xf32, #tpu.memory_space<smem>>
    %396 = vector.broadcast %395 : f32 to vector<1x128xf32>
    %397 = arith.addf %394, %396 : vector<1x128xf32>
    %c20_139 = arith.constant 20 : index
    %398 = memref.load %arg4[%c20_139] : memref<32xf32, #tpu.memory_space<smem>>
    %399 = math.tanh %397 : vector<1x128xf32>
    %400 = vector.broadcast %398 : f32 to vector<1x128xf32>
    %401 = arith.mulf %400, %399 : vector<1x128xf32>
    %402 = arith.addf %387, %401 : vector<1x128xf32>
    %c0_140 = arith.constant 0 : index
    %c21 = arith.constant 21 : index
    %403 = memref.load %arg2[%c0_140, %c21] : memref<2x32xf32, #tpu.memory_space<smem>>
    %404 = vector.broadcast %403 : f32 to vector<1x128xf32>
    %405 = arith.mulf %5, %404 : vector<1x128xf32>
    %c1_141 = arith.constant 1 : index
    %c21_142 = arith.constant 21 : index
    %406 = memref.load %arg2[%c1_141, %c21_142] : memref<2x32xf32, #tpu.memory_space<smem>>
    %407 = vector.broadcast %406 : f32 to vector<1x128xf32>
    %408 = arith.mulf %83, %407 : vector<1x128xf32>
    %409 = arith.addf %405, %408 : vector<1x128xf32>
    %c21_143 = arith.constant 21 : index
    %410 = memref.load %arg3[%c21_143] : memref<32xf32, #tpu.memory_space<smem>>
    %411 = vector.broadcast %410 : f32 to vector<1x128xf32>
    %412 = arith.addf %409, %411 : vector<1x128xf32>
    %c21_144 = arith.constant 21 : index
    %413 = memref.load %arg4[%c21_144] : memref<32xf32, #tpu.memory_space<smem>>
    %414 = math.tanh %412 : vector<1x128xf32>
    %415 = vector.broadcast %413 : f32 to vector<1x128xf32>
    %416 = arith.mulf %415, %414 : vector<1x128xf32>
    %417 = arith.addf %402, %416 : vector<1x128xf32>
    %c0_145 = arith.constant 0 : index
    %c22 = arith.constant 22 : index
    %418 = memref.load %arg2[%c0_145, %c22] : memref<2x32xf32, #tpu.memory_space<smem>>
    %419 = vector.broadcast %418 : f32 to vector<1x128xf32>
    %420 = arith.mulf %5, %419 : vector<1x128xf32>
    %c1_146 = arith.constant 1 : index
    %c22_147 = arith.constant 22 : index
    %421 = memref.load %arg2[%c1_146, %c22_147] : memref<2x32xf32, #tpu.memory_space<smem>>
    %422 = vector.broadcast %421 : f32 to vector<1x128xf32>
    %423 = arith.mulf %83, %422 : vector<1x128xf32>
    %424 = arith.addf %420, %423 : vector<1x128xf32>
    %c22_148 = arith.constant 22 : index
    %425 = memref.load %arg3[%c22_148] : memref<32xf32, #tpu.memory_space<smem>>
    %426 = vector.broadcast %425 : f32 to vector<1x128xf32>
    %427 = arith.addf %424, %426 : vector<1x128xf32>
    %c22_149 = arith.constant 22 : index
    %428 = memref.load %arg4[%c22_149] : memref<32xf32, #tpu.memory_space<smem>>
    %429 = math.tanh %427 : vector<1x128xf32>
    %430 = vector.broadcast %428 : f32 to vector<1x128xf32>
    %431 = arith.mulf %430, %429 : vector<1x128xf32>
    %432 = arith.addf %417, %431 : vector<1x128xf32>
    %c0_150 = arith.constant 0 : index
    %c23 = arith.constant 23 : index
    %433 = memref.load %arg2[%c0_150, %c23] : memref<2x32xf32, #tpu.memory_space<smem>>
    %434 = vector.broadcast %433 : f32 to vector<1x128xf32>
    %435 = arith.mulf %5, %434 : vector<1x128xf32>
    %c1_151 = arith.constant 1 : index
    %c23_152 = arith.constant 23 : index
    %436 = memref.load %arg2[%c1_151, %c23_152] : memref<2x32xf32, #tpu.memory_space<smem>>
    %437 = vector.broadcast %436 : f32 to vector<1x128xf32>
    %438 = arith.mulf %83, %437 : vector<1x128xf32>
    %439 = arith.addf %435, %438 : vector<1x128xf32>
    %c23_153 = arith.constant 23 : index
    %440 = memref.load %arg3[%c23_153] : memref<32xf32, #tpu.memory_space<smem>>
    %441 = vector.broadcast %440 : f32 to vector<1x128xf32>
    %442 = arith.addf %439, %441 : vector<1x128xf32>
    %c23_154 = arith.constant 23 : index
    %443 = memref.load %arg4[%c23_154] : memref<32xf32, #tpu.memory_space<smem>>
    %444 = math.tanh %442 : vector<1x128xf32>
    %445 = vector.broadcast %443 : f32 to vector<1x128xf32>
    %446 = arith.mulf %445, %444 : vector<1x128xf32>
    %447 = arith.addf %432, %446 : vector<1x128xf32>
    %c0_155 = arith.constant 0 : index
    %c24 = arith.constant 24 : index
    %448 = memref.load %arg2[%c0_155, %c24] : memref<2x32xf32, #tpu.memory_space<smem>>
    %449 = vector.broadcast %448 : f32 to vector<1x128xf32>
    %450 = arith.mulf %5, %449 : vector<1x128xf32>
    %c1_156 = arith.constant 1 : index
    %c24_157 = arith.constant 24 : index
    %451 = memref.load %arg2[%c1_156, %c24_157] : memref<2x32xf32, #tpu.memory_space<smem>>
    %452 = vector.broadcast %451 : f32 to vector<1x128xf32>
    %453 = arith.mulf %83, %452 : vector<1x128xf32>
    %454 = arith.addf %450, %453 : vector<1x128xf32>
    %c24_158 = arith.constant 24 : index
    %455 = memref.load %arg3[%c24_158] : memref<32xf32, #tpu.memory_space<smem>>
    %456 = vector.broadcast %455 : f32 to vector<1x128xf32>
    %457 = arith.addf %454, %456 : vector<1x128xf32>
    %c24_159 = arith.constant 24 : index
    %458 = memref.load %arg4[%c24_159] : memref<32xf32, #tpu.memory_space<smem>>
    %459 = math.tanh %457 : vector<1x128xf32>
    %460 = vector.broadcast %458 : f32 to vector<1x128xf32>
    %461 = arith.mulf %460, %459 : vector<1x128xf32>
    %462 = arith.addf %447, %461 : vector<1x128xf32>
    %c0_160 = arith.constant 0 : index
    %c25 = arith.constant 25 : index
    %463 = memref.load %arg2[%c0_160, %c25] : memref<2x32xf32, #tpu.memory_space<smem>>
    %464 = vector.broadcast %463 : f32 to vector<1x128xf32>
    %465 = arith.mulf %5, %464 : vector<1x128xf32>
    %c1_161 = arith.constant 1 : index
    %c25_162 = arith.constant 25 : index
    %466 = memref.load %arg2[%c1_161, %c25_162] : memref<2x32xf32, #tpu.memory_space<smem>>
    %467 = vector.broadcast %466 : f32 to vector<1x128xf32>
    %468 = arith.mulf %83, %467 : vector<1x128xf32>
    %469 = arith.addf %465, %468 : vector<1x128xf32>
    %c25_163 = arith.constant 25 : index
    %470 = memref.load %arg3[%c25_163] : memref<32xf32, #tpu.memory_space<smem>>
    %471 = vector.broadcast %470 : f32 to vector<1x128xf32>
    %472 = arith.addf %469, %471 : vector<1x128xf32>
    %c25_164 = arith.constant 25 : index
    %473 = memref.load %arg4[%c25_164] : memref<32xf32, #tpu.memory_space<smem>>
    %474 = math.tanh %472 : vector<1x128xf32>
    %475 = vector.broadcast %473 : f32 to vector<1x128xf32>
    %476 = arith.mulf %475, %474 : vector<1x128xf32>
    %477 = arith.addf %462, %476 : vector<1x128xf32>
    %c0_165 = arith.constant 0 : index
    %c26 = arith.constant 26 : index
    %478 = memref.load %arg2[%c0_165, %c26] : memref<2x32xf32, #tpu.memory_space<smem>>
    %479 = vector.broadcast %478 : f32 to vector<1x128xf32>
    %480 = arith.mulf %5, %479 : vector<1x128xf32>
    %c1_166 = arith.constant 1 : index
    %c26_167 = arith.constant 26 : index
    %481 = memref.load %arg2[%c1_166, %c26_167] : memref<2x32xf32, #tpu.memory_space<smem>>
    %482 = vector.broadcast %481 : f32 to vector<1x128xf32>
    %483 = arith.mulf %83, %482 : vector<1x128xf32>
    %484 = arith.addf %480, %483 : vector<1x128xf32>
    %c26_168 = arith.constant 26 : index
    %485 = memref.load %arg3[%c26_168] : memref<32xf32, #tpu.memory_space<smem>>
    %486 = vector.broadcast %485 : f32 to vector<1x128xf32>
    %487 = arith.addf %484, %486 : vector<1x128xf32>
    %c26_169 = arith.constant 26 : index
    %488 = memref.load %arg4[%c26_169] : memref<32xf32, #tpu.memory_space<smem>>
    %489 = math.tanh %487 : vector<1x128xf32>
    %490 = vector.broadcast %488 : f32 to vector<1x128xf32>
    %491 = arith.mulf %490, %489 : vector<1x128xf32>
    %492 = arith.addf %477, %491 : vector<1x128xf32>
    %c0_170 = arith.constant 0 : index
    %c27 = arith.constant 27 : index
    %493 = memref.load %arg2[%c0_170, %c27] : memref<2x32xf32, #tpu.memory_space<smem>>
    %494 = vector.broadcast %493 : f32 to vector<1x128xf32>
    %495 = arith.mulf %5, %494 : vector<1x128xf32>
    %c1_171 = arith.constant 1 : index
    %c27_172 = arith.constant 27 : index
    %496 = memref.load %arg2[%c1_171, %c27_172] : memref<2x32xf32, #tpu.memory_space<smem>>
    %497 = vector.broadcast %496 : f32 to vector<1x128xf32>
    %498 = arith.mulf %83, %497 : vector<1x128xf32>
    %499 = arith.addf %495, %498 : vector<1x128xf32>
    %c27_173 = arith.constant 27 : index
    %500 = memref.load %arg3[%c27_173] : memref<32xf32, #tpu.memory_space<smem>>
    %501 = vector.broadcast %500 : f32 to vector<1x128xf32>
    %502 = arith.addf %499, %501 : vector<1x128xf32>
    %c27_174 = arith.constant 27 : index
    %503 = memref.load %arg4[%c27_174] : memref<32xf32, #tpu.memory_space<smem>>
    %504 = math.tanh %502 : vector<1x128xf32>
    %505 = vector.broadcast %503 : f32 to vector<1x128xf32>
    %506 = arith.mulf %505, %504 : vector<1x128xf32>
    %507 = arith.addf %492, %506 : vector<1x128xf32>
    %c0_175 = arith.constant 0 : index
    %c28 = arith.constant 28 : index
    %508 = memref.load %arg2[%c0_175, %c28] : memref<2x32xf32, #tpu.memory_space<smem>>
    %509 = vector.broadcast %508 : f32 to vector<1x128xf32>
    %510 = arith.mulf %5, %509 : vector<1x128xf32>
    %c1_176 = arith.constant 1 : index
    %c28_177 = arith.constant 28 : index
    %511 = memref.load %arg2[%c1_176, %c28_177] : memref<2x32xf32, #tpu.memory_space<smem>>
    %512 = vector.broadcast %511 : f32 to vector<1x128xf32>
    %513 = arith.mulf %83, %512 : vector<1x128xf32>
    %514 = arith.addf %510, %513 : vector<1x128xf32>
    %c28_178 = arith.constant 28 : index
    %515 = memref.load %arg3[%c28_178] : memref<32xf32, #tpu.memory_space<smem>>
    %516 = vector.broadcast %515 : f32 to vector<1x128xf32>
    %517 = arith.addf %514, %516 : vector<1x128xf32>
    %c28_179 = arith.constant 28 : index
    %518 = memref.load %arg4[%c28_179] : memref<32xf32, #tpu.memory_space<smem>>
    %519 = math.tanh %517 : vector<1x128xf32>
    %520 = vector.broadcast %518 : f32 to vector<1x128xf32>
    %521 = arith.mulf %520, %519 : vector<1x128xf32>
    %522 = arith.addf %507, %521 : vector<1x128xf32>
    %c0_180 = arith.constant 0 : index
    %c29 = arith.constant 29 : index
    %523 = memref.load %arg2[%c0_180, %c29] : memref<2x32xf32, #tpu.memory_space<smem>>
    %524 = vector.broadcast %523 : f32 to vector<1x128xf32>
    %525 = arith.mulf %5, %524 : vector<1x128xf32>
    %c1_181 = arith.constant 1 : index
    %c29_182 = arith.constant 29 : index
    %526 = memref.load %arg2[%c1_181, %c29_182] : memref<2x32xf32, #tpu.memory_space<smem>>
    %527 = vector.broadcast %526 : f32 to vector<1x128xf32>
    %528 = arith.mulf %83, %527 : vector<1x128xf32>
    %529 = arith.addf %525, %528 : vector<1x128xf32>
    %c29_183 = arith.constant 29 : index
    %530 = memref.load %arg3[%c29_183] : memref<32xf32, #tpu.memory_space<smem>>
    %531 = vector.broadcast %530 : f32 to vector<1x128xf32>
    %532 = arith.addf %529, %531 : vector<1x128xf32>
    %c29_184 = arith.constant 29 : index
    %533 = memref.load %arg4[%c29_184] : memref<32xf32, #tpu.memory_space<smem>>
    %534 = math.tanh %532 : vector<1x128xf32>
    %535 = vector.broadcast %533 : f32 to vector<1x128xf32>
    %536 = arith.mulf %535, %534 : vector<1x128xf32>
    %537 = arith.addf %522, %536 : vector<1x128xf32>
    %c0_185 = arith.constant 0 : index
    %c30 = arith.constant 30 : index
    %538 = memref.load %arg2[%c0_185, %c30] : memref<2x32xf32, #tpu.memory_space<smem>>
    %539 = vector.broadcast %538 : f32 to vector<1x128xf32>
    %540 = arith.mulf %5, %539 : vector<1x128xf32>
    %c1_186 = arith.constant 1 : index
    %c30_187 = arith.constant 30 : index
    %541 = memref.load %arg2[%c1_186, %c30_187] : memref<2x32xf32, #tpu.memory_space<smem>>
    %542 = vector.broadcast %541 : f32 to vector<1x128xf32>
    %543 = arith.mulf %83, %542 : vector<1x128xf32>
    %544 = arith.addf %540, %543 : vector<1x128xf32>
    %c30_188 = arith.constant 30 : index
    %545 = memref.load %arg3[%c30_188] : memref<32xf32, #tpu.memory_space<smem>>
    %546 = vector.broadcast %545 : f32 to vector<1x128xf32>
    %547 = arith.addf %544, %546 : vector<1x128xf32>
    %c30_189 = arith.constant 30 : index
    %548 = memref.load %arg4[%c30_189] : memref<32xf32, #tpu.memory_space<smem>>
    %549 = math.tanh %547 : vector<1x128xf32>
    %550 = vector.broadcast %548 : f32 to vector<1x128xf32>
    %551 = arith.mulf %550, %549 : vector<1x128xf32>
    %552 = arith.addf %537, %551 : vector<1x128xf32>
    %c0_190 = arith.constant 0 : index
    %c31 = arith.constant 31 : index
    %553 = memref.load %arg2[%c0_190, %c31] : memref<2x32xf32, #tpu.memory_space<smem>>
    %554 = vector.broadcast %553 : f32 to vector<1x128xf32>
    %555 = arith.mulf %5, %554 : vector<1x128xf32>
    %c1_191 = arith.constant 1 : index
    %c31_192 = arith.constant 31 : index
    %556 = memref.load %arg2[%c1_191, %c31_192] : memref<2x32xf32, #tpu.memory_space<smem>>
    %557 = vector.broadcast %556 : f32 to vector<1x128xf32>
    %558 = arith.mulf %83, %557 : vector<1x128xf32>
    %559 = arith.addf %555, %558 : vector<1x128xf32>
    %c31_193 = arith.constant 31 : index
    %560 = memref.load %arg3[%c31_193] : memref<32xf32, #tpu.memory_space<smem>>
    %561 = vector.broadcast %560 : f32 to vector<1x128xf32>
    %562 = arith.addf %559, %561 : vector<1x128xf32>
    %c31_194 = arith.constant 31 : index
    %563 = memref.load %arg4[%c31_194] : memref<32xf32, #tpu.memory_space<smem>>
    %564 = math.tanh %562 : vector<1x128xf32>
    %565 = vector.broadcast %563 : f32 to vector<1x128xf32>
    %566 = arith.mulf %565, %564 : vector<1x128xf32>
    %567 = arith.addf %552, %566 : vector<1x128xf32>
    %cst_195 = arith.constant 5.000000e-01 : f32
    %568 = vector.broadcast %cst_195 : f32 to vector<1x128xf32>
    %569 = arith.mulf %568, %567 : vector<1x128xf32>
    %570 = math.tanh %569 : vector<1x128xf32>
    %cst_196 = arith.constant 1.000000e+00 : f32
    %571 = vector.broadcast %cst_196 : f32 to vector<1x128xf32>
    %572 = arith.addf %570, %571 : vector<1x128xf32>
    %cst_197 = arith.constant 5.000000e-01 : f32
    %573 = vector.broadcast %cst_197 : f32 to vector<1x128xf32>
    %574 = arith.mulf %573, %572 : vector<1x128xf32>
    %c0_198 = arith.constant 0 : index
    %c0_199 = arith.constant 0 : index
    %575 = vector.load %arg6[%c0_198, %c0_199] : memref<1x128xf32, #tpu.memory_space<vmem>>, vector<1x128xf32>
    tpu.vector_store %arg6[%c0_198, %c0_199], %574 {strides = array<i32>} : memref<1x128xf32, #tpu.memory_space<vmem>>, vector<1x128xf32>,
    return
  }
  func.func @transform_0(%arg0: i32) -> (i32, i32) {
    %c0_i32 = arith.constant 0 : i32
    %c0_i32_0 = arith.constant 0 : i32
    return %c0_i32, %arg0 : i32, i32
  }
  func.func @transform_1(%arg0: i32) -> (i32, i32) {
    %c0_i32 = arith.constant 0 : i32
    %c0_i32_0 = arith.constant 0 : i32
    %c0_i32_1 = arith.constant 0 : i32
    return %c0_i32, %c0_i32_0 : i32, i32
  }
  func.func @transform_2(%arg0: i32) -> i32 {
    %c0_i32 = arith.constant 0 : i32
    %c0_i32_0 = arith.constant 0 : i32
    return %c0_i32 : i32
  }
  func.func @transform_3(%arg0: i32) -> i32 {
    %c0_i32 = arith.constant 0 : i32
    %c0_i32_0 = arith.constant 0 : i32
    return %c0_i32 : i32
  }
  func.func @transform_4(%arg0: i32) -> i32 {
    %c0_i32 = arith.constant 0 : i32
    %c0_i32_0 = arith.constant 0 : i32
    return %c0_i32 : i32
  }
  func.func @transform_5(%arg0: i32) -> (i32, i32) {
    %c0_i32 = arith.constant 0 : i32
    %c0_i32_0 = arith.constant 0 : i32
    return %c0_i32, %arg0 : i32, i32
  }
}

</mosaic_0001>

<bundles_post_ra>
// kernel: tpu_custom_call.1
= control target key start
LH: loop header
LB: loop body
LE: loop exit
PB: predicated region body
PF: predicated region fallthrough
CT: control target
= control target key end

     0   :  { %s2153_s0 = inlined_call_operand.hbm [shape: f32[2,256], index: 0, kind: input, shape index: {}]   ;;  %s2154_s1 = inlined_call_operand.vmem [shape: f32[2,32], index: 1, kind: input, shape index: {}]   ;;  %s2155_s2 = inlined_call_operand.vmem [shape: f32[32], index: 2, kind: input, shape index: {}]   ;;  %s2156_s3 = inlined_call_operand.vmem [shape: f32[32], index: 3, kind: input, shape index: {}]   ;;  %s2157_s4 = inlined_call_operand.<no memory space> [shape: f32[1], index: 4, kind: input, shape index: {}]   ;;  %s2158_s5 = inlined_call_operand.hbm [shape: f32[1,256], index: 5, kind: output, shape index: {}]  }
   0x1   :  { %2183 = sst [smem:[#allocation37_spill]] %s2153_s0 }
   0x2   :  { %2184 = sst [smem:[#allocation38_spill]] %s2154_s1 }
   0x3   :  { %2185 = sst [smem:[#allocation39_spill]] %s2155_s2 }
   0x4   :  { %2186 = sst [smem:[#allocation40_spill]] %s2156_s3 }
   0x5   :  { %2187 = sst [smem:[#allocation41_spill]] %s2158_s5 }
   0x6   :  { %10 = sst [smem:[#allocation2]] %s2157_s4 }
   0x7   :  { %11 = vsyncpa [#allocation4], 0 }
   0x8   :  { %13 = vsyncpa [#allocation4 + $0x1], 0 }
   0x9   :  { %14 = vsyncpa [#allocation6], 0 }
   0xa   :  { %15 = vsyncpa [#allocation9], 0 }
   0xb   :  { %16 = vsyncpa [#allocation5], 0 }
   0xc   :  { %18 = vsyncpa [#allocation5 + $0x1], 0  ;;  %s1432_s20 = smov 0   ;;  %s1434_s21 = smov 0  }
   0xd   :  { %s1436_s22 = smov 0   ;;  %s1438_s23 = smov 0  }
   0xe LB: > { %2188 = sst [smem:[#allocation16_spill]] %s1379_s20  ;;  %s1453_s4 = sadd.s32 4294967295, %s1391_s23   ;;  %s1391_s23 = sphi %s1438_s23, %s2244_s23   ;;  %s1387_s22 = sphi %s1436_s22, %s2247_s22   ;;  %s1383_s21 = sphi %s1434_s21, %s2246_s21   ;;  %s1379_s20 = sphi %s1432_s20, %s2245_s20  }
   0xf   : > { %2189 = sst [smem:[#allocation17_spill]] %s1383_s21  ;;  %s944_s24 = sadd.s32 4294967294, %s1391_s23  }
  0x10   : > { %2190 = sst [smem:[#allocation18_spill]] %s1387_s22  ;;  %p44_p0 = scmp.ne.s32.totalorder %s1383_s21, %s1379_s20 }
  0x11   : > { %2191 = sst [smem:[#allocation19_spill]] %s1391_s23  ;;  %p45_p1 = scmp.eq.s32.totalorder %s1453_s4, 0 }
  0x12   : > { %2192 = sst [smem:[#allocation20_spill]] %s1453_s4  ;;  %p152_p2 = scmp.eq.s32.totalorder %s1453_s4, 1 }
  0x13   : > { %p158_p3 = scmp.eq.s32.totalorder %s944_s24, 1  ;;  %p1462_p4 = por %p45_p1, %p44_p0 }
  0x14   : > { %p945_p5 = scmp.ge.s32.totalorder %s1391_s23, 1  ;;  %p165_p7 = scmp.lt.s32.totalorder %s1391_s23, 3 }
  0x15   : > { %p1467_p6 = por %p158_p3, %p44_p0  ;;  %s2196_s2 = sld [smem:[#allocation39_spill]] }
  0x16   : > { %p1475_p8 = pnand %p945_p5, %p165_p7  ;;  %s2198_s1 = sld [smem:[#allocation38_spill]] }
  0x17   : > { %s2194_s26 = scalar_select %p1467_p6, 1, 0 }
  0x18   : > { %p1104_p10 = pneg %p1475_p8  ;;  %s2199_s3 = sld [smem:[#allocation40_spill]] }
  0x19   : > { %2195 = sst [smem:[#allocation21_spill]] %s2194_s26  ;;  %s1393_s12 = smov [#allocation8]  }
  0x1a   : > { %p1105_p11 = pnand %p1104_p10, %p45_p1  ;;  %s1394_s13 = smov [#allocation7]  }
  0x1b   : > { %s187_s29 = sshll.u32 %s2196_s2, 4  ;;  %s1395_s14 = smov [#allocation10]   ;;  %s188_s29 = int_to_ptr.vmem [resolvable:$true] %s187_s29 }
  0x1c   : > { %s177_s8 = sshll.u32 %s2198_s1, 4  ;;  %s1491_s15 = sadd.s32 1, %s1391_s23   ;;  %s178_s8 = int_to_ptr.vmem [resolvable:$true] %s177_s8 }
  0x1d   : > { %1110 = dma.vmem_to_smem (!%p1105_p11), %s188_s29, 16, %s1393_s12, [#allocation9]  }
  0x1e   : > { %s197_s11 = sshll.u32 %s2199_s3, 4  ;;  %2200 = sst [smem:[#allocation22_spill]] %s1491_s15  ;;  %s198_s11 = int_to_ptr.vmem [resolvable:$true] %s197_s11 }
  0x1f   : > { %1107 = dma.vmem_to_smem (!%p1105_p11), %s178_s8, 32, %s1394_s13, [#allocation6]  }
  0x20   : > { %1113 = dma.vmem_to_smem (!%p1105_p11), %s198_s11, 16, %s1395_s14, [#allocation9]  }
  0x21   : > { %s28_s16 = ssub.s32 %s1391_s23, %s1491_s15  ;;  %s31_s17 = sadd.s32 1, %s1387_s22 }
  0x22   : > { %p29_p12 = scmp.eq.s32.totalorder %s28_s16, 0  ;;  %p38_p13 = scmp.ne.s32.totalorder %s1387_s22, %s1383_s21 }
  0x23   : > { %p39_p0 = scmp.eq.s32.totalorder %s1391_s23, 0  ;;  %p1125_p5 = scmp.lt.s32.totalorder %s1391_s23, 2 }
  0x24   : > { %s1500_s18 = scalar_select %p29_p12, %s1387_s22, %s31_s17  }
  0x25   : > { %p1504_p3 = por %p152_p2, %p38_p13  ;;  %s211_s24 = sand.u32 1, %s1387_s22  }
  0x26   : > { %2201 = sst [smem:[#allocation23_spill]] %s1500_s18  ;;  %s951_s27 = sshll.u32 %s1391_s23, 1 }
  0x27   : > { %s2202_s19 = scalar_select %p1504_p3, 1, 0 }
  0x28   : > { %p40_p7 = por %p39_p0, %p38_p13  ;;  %s950_s28 = sshll.u32 %s211_s24, 1 }
  0x29   : > { %2203 = sst [smem:[#allocation24_spill]] %s2202_s19  ;;  %s215_s9 = scalar_lea.vmem [#allocation3], %s950_s28 }
  0x2a   : > { %s2204_s0 = sld [smem:[#allocation37_spill]]  ;;  %s223_s10 = sshll.u32 %s215_s9, 4  ;;  %s224_s10 = int_to_ptr.vmem [resolvable:$true] %s223_s10 }
  0x2b   : > { %p1514_p10 = pnand %p1125_p5, %p40_p7  ;;  %s212_s12 = scalar_lea.sflag [#allocation4], %s211_s24 }
  0x2d   : > { %p1291_p11 = pneg %p1514_p10 }
  0x30   : > { %s219_s7 = scalar_lea.hbm %s2204_s0, %s951_s27  ;;  %s1294_s27 = scalar_lea.hbm %s2204_s0, 4 }
  0x31   : > { %s221_s8 = sshll.u32 %s219_s7, 4  ;;  %s222_s8 = int_to_ptr.hbm [resolvable:$true] %s221_s8 }
  0x32   : > { %s1287_s13 = sshra.s32 %s222_s8, 4  ;;  %s1288_s13 = int_to_ptr.hbm [resolvable:$true] %s1287_s13 }
  0x33   : > { %s1289_s14 = scalar_lea.hbm %s1288_s13, 2  ;;  %p1295_p0 = scmp.lt.s32.totalorder %s1288_s13, %s2204_s0 }
  0x34   : > { %p1290_p2 = scmp.ne.s32.totalorder %s1288_s13, %s1289_s14  ;;  %p1296_p5 = scmp.lt.s32.totalorder %s1294_s27, %s1289_s14 }
  0x36   : > { %p1292_p12 = pnand %p1291_p11, %p1290_p2  ;;  %p1297_p7 = por %p1296_p5, %p1295_p0 }
  0x38   : > { %p1293_p13 = pneg %p1292_p12 }
  0x3a   : > { %p1298_p9 = pnand %p1297_p7, %p1293_p13 }
  0x3c   : > { %1301 = shalt.err (!%p1298_p9)
}
  0x3d   : > { %1117 = dma.hbm_to_vmem [thread:$0]  (!%p1514_p10), %s222_s8, 32, %s224_s10, %s212_s12  }
  0x3e   : > { %232 = sbr.rel (%p1475_p8) target bundleno = 260 (0x104), region = 40 }
  0x43   : > { %s1531_s24 = sand.u32 1, %s1383_s21  }
  0x44   : > { %2206 = sst [smem:[#allocation25_spill]] %s1531_s24  ;;  %s953_s6 = sshll.u32 %s1531_s24, 1 }
  0x45   : > { %s235_s7 = scalar_lea.sflag [#allocation4], %s1531_s24  ;;  %s238_s9 = scalar_lea.vmem [#allocation3], %s953_s6 }
  0x46   : > { %1362 = dma.done.wait (%p1462_p4), %s235_s7, 32  }
  0x47   : > { %1364 = vsyncadd (%p1462_p4), %s235_s7, 4294967264 }
  0x48   : > { %1366 = dma.done.wait (%p45_p1), [#allocation6], 32  }
  0x49   : > { %1368 = vsyncadd (%p45_p1), [#allocation6], 4294967264 }
  0x4a   : > { %1370 = dma.done.wait (%p45_p1), [#allocation9], 32  }
  0x4b   : > { %1372 = vsyncadd (%p45_p1), [#allocation9], 4294967264 }
  0x4c   : > { %259 = sfence }
  0x4d   : > { %v1547_v0 = vld [vmem:[%s238_s9] sm:$0x1]  ;;  %v1549_v1 = vld [vmem:[%s238_s9 + $0x1] sm:$0x1]  ;;  %s1559_s25 = sld [smem:[#allocation2]]  ;;  %vm1396_vm3 = vmmov 1  }
  0x4e   : > { %v283_v2 = vmul.f32 %v1547_v0, %v1547_v0  ;;  %v284_v3 = vmul.f32 %v1549_v1, %v1549_v1  ;;  %vm298_vm0 = vcmp.eq.f32.partialorder %v1547_v0, 0.0  ;;  %s1562_s30 = sld [smem:[#allocation7]]  ;;  %vm337_vm7 = vcmp.lt.f32.partialorder %v1549_v1, 0.0 }
  0x4f   : > { %v299_v4 = vsel %vm298_vm0, 1.0, %v1547_v0  ;;  %s1564_s8 = sld [smem:[#allocation7 + $0x80]]  ;;  %v1397_v33 = vmov 0.0   ;;  %vm340_vm10 = vcmp.gt.f32.partialorder %v1549_v1, 0.0  ;;  %v1398_v38 = vmov 1.0  }
  0x50   : > { %v1557_v5 = vadd.f32 %v284_v3, %v283_v2  ;;  %1168 = vrcp.f32 %v299_v4  ;;  %s1566_s10 = sld [smem:[#allocation8]]  ;;  %v341_v36 = vsel %vm337_vm7, -1.5707964, %v1397_v33  ;;  %vm332_vm11 = vcmp.lt.f32.partialorder %v1547_v0, 0.0 }
  0x51   : > { %s1568_s11 = sld [smem:[#allocation10]]  ;;  %vm334_vm12 = vcmp.ge.f32.partialorder %v1549_v1, 0.0  ;;  %v1681_v44 = vsel %vm340_vm10, 1.5707964, %v341_v36  ;;  %vm333_vm13 = vcmp.gt.f32.partialorder %v1547_v0, 0.0  ;;  %vm1752_vm14 = vmand %vm332_vm11, %vm337_vm7 }
  0x52   : > { %1170 = vrsqrt.f32 %v1557_v5  ;;  %s1570_s12 = sld [smem:[#allocation7 + $0x1]]  ;;  %vm293_vm6 = vcmp.eq.f32.partialorder %v1557_v5, inf  ;;  %v296_v30 = vand.u32 2147483648, %v1557_v5  ;;  %vm295_vm8 = vcmp.eq.f32.partialorder %v1557_v5, 0.0  ;;  %vm1766_vm15 = vmand %vm332_vm11, %vm334_vm12 }
  0x53   : > { %2207 = sst [smem:[#allocation26_spill]] %s1559_s25  ;;  %v347_v47 = vstv %s1559_s25 }
  0x54   : > { %s1575_s13 = sld [smem:[#allocation7 + $0x81]]  ;;  %v350_v40 = vstv %s1562_s30 }
  0x55   : > { %s1577_s14 = sld [smem:[#allocation8 + $0x1]]  ;;  %v353_v49 = vstv %s1564_s8 }
  0x56   : > { %v1169_v6 = vpop.eup %1168  ;;  %s1583_s16 = sld [smem:[#allocation10 + $0x1]]  ;;  %v357_v50 = vstv %s1566_s10 }
  0x57   : > { %2208 = sst [smem:[#allocation27_spill]] %s1568_s11  ;;  %v1573_v7 = vmul.f32 %v1169_v6, %v1549_v1  ;;  %v361_v58 = vstv %s1568_s11 }
  0x58   : > { %v1171_v8 = vpop.eup %1170  ;;  %s1585_s17 = sld [smem:[#allocation7 + $0x2]]  ;;  %v365_v43 = vstv %s1570_s12 }
  0x59   : > { %v287_v9 = vmul.f32 %v1171_v8, %v1557_v5  ;;  %v1581_v10 = vand.u32 2147483647, %v1573_v7  ;;  %s1588_s27 = sld [smem:[#allocation7 + $0x82]]  ;;  %vm302_vm9 = vcmp.lt.f32.partialorder %v1573_v7, 0.0 }
  0x5a   : > { %s1591_s28 = sld [smem:[#allocation8 + $0x2]]  ;;  %v303_v39 = vsel %vm302_vm9, -1.0, %v1398_v38  ;;  %v368_v52 = vstv %s1575_s13 }
  0x5b   : > { %v309_v11 = vmax.f32 %v1581_v10, 1e-30  ;;  %v313_v12 = vadd.f32 1.0, %v1581_v10  ;;  %v288_v13 = vmul.f32 %v1171_v8, %v287_v9  ;;  %s1593_s29 = sld [smem:[#allocation10 + $0x2]]  ;;  %vm305_vm1 = vcmp.gt.f32.partialorder %v1581_v10, 2.4142137 }
  0x5c   : > { %2209 = sst [smem:[#allocation28_spill]] %s1583_s16  ;;  %vm306_vm2 = vcmp.gt.f32.partialorder %v1581_v10, 0.41421357  ;;  %vm307_vm4 = vmxor %vm305_vm1, %vm1396_vm3  ;;  %v957_v15 = vadd.f32 -1.0, %v1581_v10  ;;  %v372_v59 = vstv %s1577_s14 }
  0x5d   : > { %1172 = vrcp.f32 %v309_v11  ;;  %s1596_s6 = sld [smem:[#allocation7 + $0x3]]  ;;  %v289_v14 = vmul.f32 0.5, %v288_v13  ;;  %vm1612_vm5 = vmand %vm306_vm2, %vm307_vm4 }
  0x5e   : > { %1174 = vrcp.f32 %v313_v12  ;;  %s1598_s7 = sld [smem:[#allocation7 + $0x83]]  ;;  %v318_v34 = vsel %vm1612_vm5, 0.7853982, %v1397_v33  ;;  %v380_v45 = vstv %s1585_s17 }
  0x5f   : > { %s1600_s9 = sld [smem:[#allocation8 + $0x3]]  ;;  %v290_v20 = vsub.f32 1.5, %v289_v14  ;;  %v319_v41 = vsel %vm305_vm1, 1.5707964, %v318_v34  ;;  %v383_v56 = vstv %s1588_s27 }
  0x60   : > { %s1606_s0 = sld [smem:[#allocation10 + $0x3]]  ;;  %v387_v63 = vstv %s1591_s28 }
  0x61   : > { %2210 = sst [smem:[#allocation29_spill]] %s1593_s29  ;;  %v291_v24 = vmul.f32 %v1171_v8, %v290_v20 }
  0x62   : > { %s1608_s1 = sld [smem:[#allocation7 + $0x4]] }
  0x63   : > { %v1173_v16 = vpop.eup %1172  ;;  %s1610_s2 = sld [smem:[#allocation7 + $0x84]]  ;;  %v292_v27 = vmul.f32 %v291_v24, %v1557_v5  ;;  %v395_v53 = vstv %s1596_s6 }
  0x64   : > { %v1175_v17 = vpop.eup %1174  ;;  %v311_v19 = vsub.f32 0.0, %v1173_v16  ;;  %s1616_s3 = sld [smem:[#allocation8 + $0x4]]  ;;  %v398_v60 = vstv %s1598_s7 }
  0x65   : > { %v315_v21 = vmul.f32 %v1175_v17, %v957_v15  ;;  %s1618_s18 = sld [smem:[#allocation10 + $0x4]]  ;;  %v294_v31 = vsel %vm293_vm6, %v1557_v5, %v292_v27  ;;  %v402_v4 = vstv %s1600_s9  ;;  %v376_v17 = vstv %s1583_s16 }
  0x66   : > { %2211 = sst [smem:[#allocation30_spill]] %s1606_s0  ;;  %v1669_v37 = vsel %vm295_vm8, %v296_v30, %v294_v31 }
  0x67   : > { %s1620_s22 = sld [smem:[#allocation7 + $0x5]]  ;;  %v316_v22 = vsel %vm1612_vm5, %v315_v21, %v1581_v10  ;;  %v1688_v48 = vmul.f32 %v350_v40, %v1669_v37  ;;  %v1695_v51 = vmul.f32 %v365_v43, %v1669_v37  ;;  %v1703_v55 = vmul.f32 %v380_v45, %v1669_v37 }
  0x68   : > { %s1625_s21 = sld [smem:[#allocation7 + $0x85]]  ;;  %v1629_v23 = vsel %vm305_vm1, %v311_v19, %v316_v22  ;;  %v410_v57 = vstv %s1608_s1  ;;  %v1719_v2 = vmul.f32 %v395_v53, %v1669_v37  ;;  %v391_v21 = vstv %s1593_s29 }
  0x69   : > { %s1631_s15 = sld [smem:[#allocation8 + $0x5]]  ;;  %v320_v25 = vmul.f32 %v1629_v23, %v1629_v23  ;;  %v1726_v5 = vmul.f32 %v410_v57, %v1669_v37  ;;  %v413_v6 = vstv %s1610_s2 }
  0x6a   : > { %s1635_s23 = sld [smem:[#allocation10 + $0x5]]  ;;  %v417_v9 = vstv %s1616_s3 }
  0x6b   : > { %2214 = sst [smem:[#allocation31_spill]] %s1618_s18  ;;  %v321_v26 = vmul.f32 0.080537446, %v320_v25 }
  0x6c   : > { %s1637_s26 = sld [smem:[#allocation7 + $0x6]] }
  0x6d   : > { %s1639_s20 = sld [smem:[#allocation7 + $0x86]]  ;;  %v958_v28 = vadd.f32 -0.13877685, %v321_v26  ;;  %v425_v61 = vstv %s1620_s22 }
  0x6e   : > { %s1641_s19 = sld [smem:[#allocation8 + $0x6]]  ;;  %v426_v10 = vmul.f32 %v425_v61, %v1669_v37  ;;  %v428_v11 = vstv %s1625_s21 }
  0x6f   : > { %s1644_s5 = sld [smem:[#allocation10 + $0x6]]  ;;  %v323_v29 = vmul.f32 %v958_v28, %v320_v25  ;;  %v432_v12 = vstv %s1631_s15 }
  0x70   : > { %2215 = sst [smem:[#allocation32_spill]] %s1635_s23 }
  0x71   : > { %s1647_s24 = sld [smem:[#allocation7 + $0x7]]  ;;  %v324_v32 = vadd.f32 0.19977711, %v323_v29 }
  0x72   : > { %s1649_s4 = sld [smem:[#allocation7 + $0x87]]  ;;  %v440_v3 = vstv %s1637_s26 }
  0x73   : > { %s1653_s23 = sld [smem:[#allocation8 + $0x7]]  ;;  %v325_v35 = vmul.f32 %v324_v32, %v320_v25  ;;  %v441_v13 = vmul.f32 %v440_v3, %v1669_v37  ;;  %v443_v14 = vstv %s1639_s20 }
  0x74   : > { %s1662_s18 = sld [smem:[#allocation7 + $0x8]]  ;;  %v447_v22 = vstv %s1641_s19 }
  0x75   : > { %2216 = sst [smem:[#allocation33_spill]] %s1644_s5  ;;  %v959_v42 = vadd.f32 -0.3333295, %v325_v35 }
  0x76   : > { %s1658_s5 = sld [smem:[#allocation10 + $0x7]] }
  0x77   : > { %s1667_s0 = sld [smem:[#allocation7 + $0x88]]  ;;  %v327_v46 = vmul.f32 %v959_v42, %v320_v25  ;;  %v455_v7 = vstv %s1647_s24 }
  0x78   : > { %s1684_s30 = sld [smem:[#allocation7 + $0x9]]  ;;  %v456_v18 = vmul.f32 %v455_v7, %v1669_v37  ;;  %v458_v19 = vstv %s1649_s4 }
  0x79   : > { %2217 = sst [smem:[#allocation34_spill]] %s1653_s23  ;;  %v328_v54 = vmul.f32 %v327_v46, %v1629_v23 }
  0x7a   : > { %s1677_s23 = sld [smem:[#allocation10 + $0x8]]  ;;  %v470_v15 = vstv %s1662_s18 }
  0x7b   : > { %s1691_s12 = sld [smem:[#allocation7 + $0x89]]  ;;  %v329_v62 = vadd.f32 %v328_v54, %v1629_v23  ;;  %v1772_v29 = vmul.f32 %v470_v15, %v1669_v37 }
  0x7c   : > { %2218 = sst [smem:[#allocation35_spill]] %s1658_s5 }
  0x7d   : > { %s1672_s5 = sld [smem:[#allocation8 + $0x8]]  ;;  %v330_v8 = vadd.f32 %v329_v62, %v319_v41  ;;  %v473_v31 = vstv %s1667_s0 }
  0x7e   : > { %s1699_s17 = sld [smem:[#allocation8 + $0x9]]  ;;  %v485_v24 = vstv %s1684_s30 }
  0x7f   : > { %s1707_s25 = sld [smem:[#allocation10 + $0x9]]  ;;  %v331_v16 = vmul.f32 %v330_v8, %v303_v39  ;;  %v486_v35 = vmul.f32 %v485_v24, %v1669_v37 }
  0x80   : > { %s1714_s6 = sld [smem:[#allocation7 + $0xa]] }
  0x81   : > { %s1722_s1 = sld [smem:[#allocation7 + $0x8a]]  ;;  %v336_v26 = vadd.f32 3.1415927, %v331_v16  ;;  %v960_v27 = vadd.f32 -3.1415927, %v331_v16  ;;  %v488_v36 = vstv %s1691_s12 }
  0x82   : > { %s1730_s22 = sld [smem:[#allocation8 + $0xa]] }
  0x83   : > { %s2220_s11 = sld [smem:[#allocation34_spill]]  ;;  %v477_v1 = vstv %s1672_s5  ;;  %v343_v33 = vsel %vm1752_vm14, %v960_v27, %v1681_v44 }
  0x84   : > { %s1735_s26 = sld [smem:[#allocation7 + $0xb]]  ;;  %v344_v38 = vsel %vm1766_vm15, %v336_v26, %v343_v33  ;;  %v492_v41 = vstv %s1699_s17 }
  0x85   : > { %2219 = sst [smem:[#allocation36_spill]] %s1707_s25  ;;  %v1799_v42 = vsel %vm333_vm13, %v331_v16, %v344_v38 }
  0x86   : > { %s2221_s2 = sld [smem:[#allocation30_spill]]  ;;  %v500_v32 = vstv %s1714_s6  ;;  %v354_v46 = vmul.f32 %v353_v49, %v1799_v42  ;;  %v369_v53 = vmul.f32 %v368_v52, %v1799_v42  ;;  %v384_v54 = vmul.f32 %v383_v56, %v1799_v42 }
  0x87   : > { %s1741_s24 = sld [smem:[#allocation10 + $0xa]]  ;;  %v501_v43 = vmul.f32 %v500_v32, %v1669_v37  ;;  %v503_v44 = vstv %s1722_s1  ;;  %v399_v0 = vmul.f32 %v398_v60, %v1799_v42  ;;  %v414_v57 = vmul.f32 %v413_v6, %v1799_v42 }
  0x88   : > { %s2222_s25 = sld [smem:[#allocation31_spill]]  ;;  %v429_v61 = vmul.f32 %v428_v11, %v1799_v42  ;;  %v444_v49 = vmul.f32 %v443_v14, %v1799_v42  ;;  %v459_v52 = vmul.f32 %v458_v19, %v1799_v42  ;;  %v355_v56 = vadd.f32 %v354_v46, %v1688_v48 }
  0x89   : > { %s1746_s21 = sld [smem:[#allocation7 + $0x8b]]  ;;  %v462_v23 = vstv %s2220_s11  ;;  %v370_v60 = vadd.f32 %v369_v53, %v1695_v51  ;;  %v385_v62 = vadd.f32 %v384_v54, %v1703_v55  ;;  %v400_v3 = vadd.f32 %v399_v0, %v1719_v2 }
  0x8a   : > { %s2225_s20 = sld [smem:[#allocation32_spill]]  ;;  %v515_v45 = vstv %s1735_s26  ;;  %v415_v6 = vadd.f32 %v414_v57, %v1726_v5  ;;  %v430_v7 = vadd.f32 %v429_v61, %v426_v10  ;;  %v445_v8 = vadd.f32 %v444_v49, %v441_v13 }
  0x8b   : > { %s1760_s18 = sld [smem:[#allocation8 + $0xb]]  ;;  %v460_v11 = vadd.f32 %v459_v52, %v456_v18  ;;  %v358_v14 = vadd.f32 %v357_v50, %v355_v56  ;;  %v373_v48 = vadd.f32 %v372_v59, %v370_v60  ;;  %v388_v51 = vadd.f32 %v387_v63, %v385_v62 }
  0x8c   : > { %s2228_s4 = sld [smem:[#allocation33_spill]]  ;;  %v406_v28 = vstv %s2221_s2  ;;  %v507_v55 = vstv %s1730_s22  ;;  %v403_v2 = vadd.f32 %v402_v4, %v400_v3  ;;  %v418_v5 = vadd.f32 %v417_v9, %v415_v6 }
  0x8d   : > { %s2229_s16 = sld [smem:[#allocation35_spill]]  ;;  %v516_v10 = vmul.f32 %v515_v45, %v1669_v37  ;;  %1176 = vtanh.f32 %v358_v14  ;;  %v474_v50 = vmul.f32 %v473_v31, %v1799_v42  ;;  %v489_v59 = vmul.f32 %v488_v36, %v1799_v42 }
  0x8e   : > { %s1774_s30 = sld [smem:[#allocation10 + $0xb]]  ;;  %v421_v30 = vstv %s2222_s25  ;;  %v504_v63 = vmul.f32 %v503_v44, %v1799_v42  ;;  %1178 = vtanh.f32 %v373_v48  ;;  %v433_v4 = vadd.f32 %v432_v12, %v430_v7 }
  0x8f   : > { %s1780_s29 = sld [smem:[#allocation7 + $0xc]]  ;;  %v518_v13 = vstv %s1746_s21  ;;  %v448_v9 = vadd.f32 %v447_v22, %v445_v8  ;;  %v463_v15 = vadd.f32 %v462_v23, %v460_v11  ;;  %1180 = vtanh.f32 %v388_v51 }
  0x90   : > { %v436_v34 = vstv %s2225_s20  ;;  %s1788_s25 = sld [smem:[#allocation7 + $0x8c]]  ;;  %v475_v16 = vadd.f32 %v474_v50, %v1772_v29  ;;  %v490_v18 = vadd.f32 %v489_v59, %v486_v35  ;;  %v519_v19 = vmul.f32 %v518_v13, %v1799_v42 }
  0x91   : > { %s1795_s0 = sld [smem:[#allocation8 + $0xc]]  ;;  %1182 = vtanh.f32 %v403_v2  ;;  %v505_v20 = vadd.f32 %v504_v63, %v501_v43  ;;  %v481_v22 = vstv %s1677_s23  ;;  %v522_v25 = vstv %s1760_s18 }
  0x92   : > { %v451_v39 = vstv %s2228_s4  ;;  %s1804_s6 = sld [smem:[#allocation10 + $0xc]]  ;;  %1184 = vtanh.f32 %v418_v5  ;;  %v478_v26 = vadd.f32 %v477_v1, %v475_v16  ;;  %v493_v32 = vadd.f32 %v492_v41, %v490_v18 }
  0x93   : > { %v466_v40 = vstv %s2229_s16  ;;  %s1818_s12 = sld [smem:[#allocation7 + $0xd]]  ;;  %1186 = vtanh.f32 %v433_v4  ;;  %v1177_v31 = vpop.eup %1176  ;;  %v520_v33 = vadd.f32 %v519_v19, %v516_v10  ;;  %v508_v38 = vadd.f32 %v507_v55, %v505_v20 }
  0x94   : > { %s1824_s8 = sld [smem:[#allocation7 + $0x8d]]  ;;  %1188 = vtanh.f32 %v448_v9  ;;  %v1179_v36 = vpop.eup %1178  ;;  %v362_v1 = vmul.f32 %v1177_v31, %v361_v58  ;;  %v511_v43 = vstv %s1741_s24  ;;  %v526_v49 = vstv %s1774_s30 }
  0x95   : > { %s1830_s13 = sld [smem:[#allocation8 + $0xd]]  ;;  %v530_v12 = vstv %s1780_s29  ;;  %1190 = vtanh.f32 %v463_v15  ;;  %v1181_v44 = vpop.eup %1180  ;;  %v377_v45 = vmul.f32 %v1179_v36, %v376_v17  ;;  %v523_v17 = vadd.f32 %v522_v25, %v520_v33 }
  0x96   : > { %s1833_s27 = sld [smem:[#allocation10 + $0xd]]  ;;  %v533_v24 = vstv %s1788_s25  ;;  %v531_v27 = vmul.f32 %v530_v12, %v1669_v37  ;;  %v363_v58 = vadd.f32 %v362_v1, %v347_v47  ;;  %v392_v0 = vmul.f32 %v1181_v44, %v391_v21 }
  0x97   : > { %s1842_s7 = sld [smem:[#allocation7 + $0xe]]  ;;  %v534_v29 = vmul.f32 %v533_v24, %v1799_v42  ;;  %v1183_v54 = vpop.eup %1182  ;;  %1192 = vtanh.f32 %v478_v26  ;;  %v537_v57 = vstv %s1795_s0 }
  0x98   : > { %s1850_s1 = sld [smem:[#allocation7 + $0x8e]]  ;;  %v1185_v61 = vpop.eup %1184  ;;  %1194 = vtanh.f32 %v493_v32  ;;  %v378_v47 = vadd.f32 %v377_v45, %v363_v58  ;;  %v407_v21 = vmul.f32 %v1183_v54, %v406_v28  ;;  %v541_v6 = vstv %s1804_s6 }
  0x99   : > { %s1855_s10 = sld [smem:[#allocation8 + $0xe]]  ;;  %v545_v35 = vstv %s1818_s12  ;;  %v535_v41 = vadd.f32 %v534_v29, %v531_v27  ;;  %v1187_v56 = vpop.eup %1186  ;;  %1196 = vtanh.f32 %v508_v38  ;;  %v422_v28 = vmul.f32 %v1185_v61, %v421_v30 }
  0x9a   : > { %s2230_s3 = sld [smem:[#allocation36_spill]]  ;;  %v546_v46 = vmul.f32 %v545_v35, %v1669_v37  ;;  %v548_v53 = vstv %s1824_s8  ;;  %v1189_v62 = vpop.eup %1188  ;;  %v393_v14 = vadd.f32 %v392_v0, %v378_v47  ;;  %v437_v55 = vmul.f32 %v1187_v56, %v436_v34 }
  0x9b   : > { %s1863_s14 = sld [smem:[#allocation10 + $0xe]]  ;;  %v549_v52 = vmul.f32 %v548_v53, %v1799_v42  ;;  %v538_v3 = vadd.f32 %v537_v57, %v535_v41  ;;  %v1191_v11 = vpop.eup %1190  ;;  %v552_v48 = vstv %s1830_s13  ;;  %1198 = vtanh.f32 %v523_v17 }
  0x9c   : > { %s1867_s28 = sld [smem:[#allocation7 + $0xf]]  ;;  %v556_v2 = vstv %s1833_s27  ;;  %v408_v13 = vadd.f32 %v407_v21, %v393_v14  ;;  %v452_v18 = vmul.f32 %v1189_v62, %v451_v39  ;;  %v467_v19 = vmul.f32 %v1191_v11, %v466_v40 }
  0x9d   : > { %s1871_s15 = sld [smem:[#allocation7 + $0x8f]]  ;;  %v560_v60 = vstv %s1842_s7  ;;  %v550_v7 = vadd.f32 %v549_v52, %v546_v46  ;;  %v1193_v10 = vpop.eup %1192  ;;  %1200 = vtanh.f32 %v538_v3 }
  0x9e   : > { %s1876_s11 = sld [smem:[#allocation8 + $0xf]]  ;;  %v561_v8 = vmul.f32 %v560_v60, %v1669_v37  ;;  %v563_v51 = vstv %s1850_s1  ;;  %v1195_v63 = vpop.eup %1194  ;;  %v423_v16 = vadd.f32 %v422_v28, %v408_v13  ;;  %v482_v29 = vmul.f32 %v1193_v10, %v481_v22 }
  0x9f   : > { %s1882_s25 = sld [smem:[#allocation10 + $0xf]]  ;;  %v564_v5 = vmul.f32 %v563_v51, %v1799_v42  ;;  %v567_v50 = vstv %s1855_s10  ;;  %v553_v34 = vadd.f32 %v552_v48, %v550_v7  ;;  %v1197_v15 = vpop.eup %1196 }
  0xa0   : > { %v496_v23 = vstv %s2230_s3  ;;  %s1887_s26 = sld [smem:[#allocation7 + $0x10]]  ;;  %v438_v27 = vadd.f32 %v437_v55, %v423_v16  ;;  %v512_v33 = vmul.f32 %v1197_v15, %v511_v43 }
  0xa1   : > { %s1892_s5 = sld [smem:[#allocation7 + $0x90]]  ;;  %v565_v4 = vadd.f32 %v564_v5, %v561_v8  ;;  %v571_v24 = vstv %s1863_s14  ;;  %v1199_v40 = vpop.eup %1198  ;;  %v497_v32 = vmul.f32 %v1195_v63, %v496_v23  ;;  %1202 = vtanh.f32 %v553_v34 }
  0xa2   : > { %s1898_s17 = sld [smem:[#allocation8 + $0x10]]  ;;  %v575_v59 = vstv %s1867_s28  ;;  %v453_v36 = vadd.f32 %v452_v18, %v438_v27  ;;  %v527_v46 = vmul.f32 %v1199_v40, %v526_v49 }
  0xa3   : > { %s1905_s21 = sld [smem:[#allocation10 + $0x10]]  ;;  %v578_v30 = vstv %s1871_s15  ;;  %v576_v9 = vmul.f32 %v575_v59, %v1669_v37  ;;  %v568_v12 = vadd.f32 %v567_v50, %v565_v4  ;;  %v1201_v44 = vpop.eup %1200 }
  0xa4   : > { %s1909_s12 = sld [smem:[#allocation7 + $0x11]]  ;;  %v579_v20 = vmul.f32 %v578_v30, %v1799_v42  ;;  %v582_v25 = vstv %s1876_s11  ;;  %v468_v41 = vadd.f32 %v467_v19, %v453_v36  ;;  %v542_v7 = vmul.f32 %v1201_v44, %v541_v6 }
  0xa5   : > { %s1914_s0 = sld [smem:[#allocation7 + $0x91]]  ;;  %1204 = vtanh.f32 %v568_v12  ;;  %v586_v8 = vstv %s1882_s25 }
  0xa6   : > { %s1918_s8 = sld [smem:[#allocation8 + $0x11]]  ;;  %v590_v26 = vstv %s1887_s26  ;;  %v580_v31 = vadd.f32 %v579_v20, %v576_v9  ;;  %v483_v61 = vadd.f32 %v482_v29, %v468_v41 }
  0xa7   : > { %s1924_s2 = sld [smem:[#allocation10 + $0x11]]  ;;  %v591_v39 = vmul.f32 %v590_v26, %v1669_v37  ;;  %v593_v35 = vstv %s1892_s5  ;;  %v1203_v56 = vpop.eup %1202 }
  0xa8   : > { %s1930_s7 = sld [smem:[#allocation7 + $0x12]]  ;;  %v583_v22 = vadd.f32 %v582_v25, %v580_v31  ;;  %v594_v1 = vmul.f32 %v593_v35, %v1799_v42  ;;  %v597_v23 = vstv %s1898_s17  ;;  %v498_v3 = vadd.f32 %v497_v32, %v483_v61 }
  0xa9   : > { %s1935_s13 = sld [smem:[#allocation7 + $0x92]]  ;;  %v601_v50 = vstv %s1905_s21  ;;  %v557_v34 = vmul.f32 %v1203_v56, %v556_v2 }
  0xaa   : > { %s1938_s20 = sld [smem:[#allocation8 + $0x12]]  ;;  %v605_v38 = vstv %s1909_s12  ;;  %v595_v53 = vadd.f32 %v594_v1, %v591_v39  ;;  %1206 = vtanh.f32 %v583_v22  ;;  %v513_v55 = vadd.f32 %v512_v33, %v498_v3 }
  0xab   : > { %s1945_s1 = sld [smem:[#allocation7 + $0x13]]  ;;  %v606_v43 = vmul.f32 %v605_v38, %v1669_v37  ;;  %v608_v45 = vstv %s1914_s0  ;;  %v1205_v14 = vpop.eup %1204 }
  0xac   : > { %s1950_s10 = sld [smem:[#allocation7 + $0x93]]  ;;  %v612_v54 = vstv %s1918_s8  ;;  %v609_v58 = vmul.f32 %v608_v45, %v1799_v42  ;;  %v598_v17 = vadd.f32 %v597_v23, %v595_v53  ;;  %v528_v63 = vadd.f32 %v527_v46, %v513_v55 }
  0xad   : > { %s1955_s16 = sld [smem:[#allocation10 + $0x12]]  ;;  %v572_v4 = vmul.f32 %v1205_v14, %v571_v24  ;;  %v616_v24 = vstv %s1924_s2 }
  0xae   : > { %s1962_s4 = sld [smem:[#allocation8 + $0x13]]  ;;  %v620_v0 = vstv %s1930_s7  ;;  %v610_v47 = vadd.f32 %v609_v58, %v606_v43  ;;  %1208 = vtanh.f32 %v598_v17  ;;  %v543_v19 = vadd.f32 %v542_v7, %v528_v63 }
  0xaf   : > { %s1966_s23 = sld [smem:[#allocation7 + $0x14]]  ;;  %v623_v57 = vstv %s1935_s13  ;;  %v621_v49 = vmul.f32 %v620_v0, %v1669_v37 }
  0xb0   : > { %s1971_s24 = sld [smem:[#allocation10 + $0x13]]  ;;  %v624_v52 = vmul.f32 %v623_v57, %v1799_v42  ;;  %v627_v21 = vstv %s1938_s20  ;;  %v613_v28 = vadd.f32 %v612_v54, %v610_v47  ;;  %v1207_v13 = vpop.eup %1206  ;;  %v558_v29 = vadd.f32 %v557_v34, %v543_v19 }
  0xb1   : > { %s1976_s3 = sld [smem:[#allocation7 + $0x94]]  ;;  %v635_v60 = vstv %s1945_s1  ;;  %v587_v31 = vmul.f32 %v1207_v13, %v586_v8 }
  0xb2   : > { %s1981_s28 = sld [smem:[#allocation8 + $0x14]]  ;;  %v638_v62 = vstv %s1950_s10  ;;  %v625_v11 = vadd.f32 %v624_v52, %v621_v49  ;;  %v636_v48 = vmul.f32 %v635_v60, %v1669_v37  ;;  %1210 = vtanh.f32 %v613_v28 }
  0xb3   : > { %s1985_s30 = sld [smem:[#allocation7 + $0x15]]  ;;  %v639_v51 = vmul.f32 %v638_v62, %v1799_v42  ;;  %v573_v1 = vadd.f32 %v572_v4, %v558_v29  ;;  %v631_v44 = vstv %s1955_s16 }
  0xb4   : > { %s1990_s15 = sld [smem:[#allocation7 + $0x95]]  ;;  %v628_v5 = vadd.f32 %v627_v21, %v625_v11  ;;  %v642_v6 = vstv %s1962_s4  ;;  %v1209_v2 = vpop.eup %1208 }
  0xb5   : > { %s1995_s19 = sld [smem:[#allocation8 + $0x15]]  ;;  %v650_v10 = vstv %s1966_s23  ;;  %v640_v59 = vadd.f32 %v639_v51, %v636_v48  ;;  %v602_v38 = vmul.f32 %v1209_v2, %v601_v50  ;;  %v588_v53 = vadd.f32 %v587_v31, %v573_v1 }
  0xb6   : > { %s1999_s11 = sld [smem:[#allocation10 + $0x14]]  ;;  %v651_v30 = vmul.f32 %v650_v10, %v1669_v37  ;;  %1212 = vtanh.f32 %v628_v5  ;;  %v646_v45 = vstv %s1971_s24 }
  0xb7   : > { %s2003_s6 = sld [smem:[#allocation7 + $0x16]]  ;;  %v653_v9 = vstv %s1976_s3  ;;  %v643_v15 = vadd.f32 %v642_v6, %v640_v59  ;;  %v603_v49 = vadd.f32 %v602_v38, %v588_v53 }
  0xb8   : > { %s2007_s9 = sld [smem:[#allocation7 + $0x96]]  ;;  %v654_v16 = vmul.f32 %v653_v9, %v1799_v42  ;;  %v657_v20 = vstv %s1981_s28  ;;  %v1211_v32 = vpop.eup %1210 }
  0xb9   : > { %s2014_s25 = sld [smem:[#allocation8 + $0x16]]  ;;  %v665_v18 = vstv %s1985_s30  ;;  %1214 = vtanh.f32 %v643_v15  ;;  %v617_v54 = vmul.f32 %v1211_v32, %v616_v24 }
  0xba   : > { %s2018_s29 = sld [smem:[#allocation10 + $0x15]]  ;;  %v666_v12 = vmul.f32 %v665_v18, %v1669_v37  ;;  %v668_v25 = vstv %s1990_s15  ;;  %v655_v26 = vadd.f32 %v654_v16, %v651_v30 }
  0xbb   : > { %s2023_s27 = sld [smem:[#allocation7 + $0x17]]  ;;  %v669_v27 = vmul.f32 %v668_v25, %v1799_v42  ;;  %v672_v39 = vstv %s1995_s19  ;;  %v618_v3 = vadd.f32 %v617_v54, %v603_v49 }
  0xbc   : > { %s2027_s14 = sld [smem:[#allocation7 + $0x97]]  ;;  %v658_v33 = vadd.f32 %v657_v20, %v655_v26  ;;  %v1213_v43 = vpop.eup %1212  ;;  %v661_v60 = vstv %s1999_s11 }
  0xbd   : > { %v680_v40 = vstv %s2003_s6  ;;  %s2031_s22 = sld [smem:[#allocation8 + $0x17]]  ;;  %v670_v35 = vadd.f32 %v669_v27, %v666_v12  ;;  %v632_v52 = vmul.f32 %v1213_v43, %v631_v44 }
  0xbe   : > { %v681_v36 = vmul.f32 %v680_v40, %v1669_v37  ;;  %v683_v22 = vstv %s2007_s9  ;;  %s2035_s26 = sld [smem:[#allocation10 + $0x16]]  ;;  %1216 = vtanh.f32 %v658_v33 }
  0xbf   : > { %v684_v23 = vmul.f32 %v683_v22, %v1799_v42  ;;  %s2039_s5 = sld [smem:[#allocation7 + $0x18]]  ;;  %v673_v41 = vadd.f32 %v672_v39, %v670_v35  ;;  %v687_v46 = vstv %s2014_s25  ;;  %v1215_v57 = vpop.eup %1214  ;;  %v633_v51 = vadd.f32 %v632_v52, %v618_v3 }
  0xc0   : > { %s2043_s17 = sld [smem:[#allocation7 + $0x98]]  ;;  %v647_v21 = vmul.f32 %v1215_v57, %v646_v45  ;;  %v676_v14 = vstv %s2018_s29 }
  0xc1   : > { %v685_v58 = vadd.f32 %v684_v23, %v681_v36  ;;  %v695_v0 = vstv %s2023_s27  ;;  %s2046_s21 = sld [smem:[#allocation8 + $0x18]]  ;;  %1218 = vtanh.f32 %v673_v41 }
  0xc2   : > { %v696_v61 = vmul.f32 %v695_v0, %v1669_v37  ;;  %v698_v17 = vstv %s2027_s14  ;;  %s2050_s18 = sld [smem:[#allocation10 + $0x17]]  ;;  %v648_v59 = vadd.f32 %v647_v21, %v633_v51 }
  0xc3   : > { %v688_v56 = vadd.f32 %v687_v46, %v685_v58  ;;  %v699_v47 = vmul.f32 %v698_v17, %v1799_v42  ;;  %s2053_s12 = sld [smem:[#allocation7 + $0x19]]  ;;  %v702_v62 = vstv %s2031_s22 }
  0xc4   : > { %s2057_s0 = sld [smem:[#allocation7 + $0x99]]  ;;  %v1217_v11 = vpop.eup %1216  ;;  %v691_v13 = vstv %s2035_s26 }
  0xc5   : > { %1220 = vtanh.f32 %v688_v56  ;;  %v700_v7 = vadd.f32 %v699_v47, %v696_v61  ;;  %v710_v8 = vstv %s2039_s5  ;;  %s2060_s8 = sld [smem:[#allocation8 + $0x19]]  ;;  %v662_v55 = vmul.f32 %v1217_v11, %v661_v60 }
  0xc6   : > { %v711_v28 = vmul.f32 %v710_v8, %v1669_v37  ;;  %v713_v48 = vstv %s2043_s17  ;;  %s2065_s2 = sld [smem:[#allocation10 + $0x18]] }
  0xc7   : > { %v703_v5 = vadd.f32 %v702_v62, %v700_v7  ;;  %v714_v6 = vmul.f32 %v713_v48, %v1799_v42  ;;  %s1062_s7 = sld [smem:[#allocation7 + $0x1a]]  ;;  %v1219_v10 = vpop.eup %1218  ;;  %v717_v50 = vstv %s2046_s21  ;;  %v663_v15 = vadd.f32 %v662_v55, %v648_v59 }
  0xc8   : > { %s1063_s13 = sld [smem:[#allocation7 + $0x9a]]  ;;  %v677_v30 = vmul.f32 %v1219_v10, %v676_v14  ;;  %v706_v12 = vstv %s2050_s18 }
  0xc9   : > { %1222 = vtanh.f32 %v703_v5  ;;  %v715_v63 = vadd.f32 %v714_v6, %v711_v28  ;;  %s2070_s20 = sld [smem:[#allocation8 + $0x1a]]  ;;  %v725_v34 = vstv %s2053_s12 }
  0xca   : > { %v728_v4 = vstv %s2057_s0  ;;  %s2074_s1 = sld [smem:[#allocation10 + $0x19]]  ;;  %v726_v18 = vmul.f32 %v725_v34, %v1669_v37  ;;  %v678_v2 = vadd.f32 %v677_v30, %v663_v15 }
  0xcb   : > { %v1221_v9 = vpop.eup %1220  ;;  %v718_v16 = vadd.f32 %v717_v50, %v715_v63  ;;  %v729_v19 = vmul.f32 %v728_v4, %v1799_v42  ;;  %s1066_s10 = sld [smem:[#allocation7 + $0x1b]]  ;;  %v732_v25 = vstv %s2060_s8 }
  0xcc   : > { %v692_v20 = vmul.f32 %v1221_v9, %v691_v13  ;;  %s1067_s16 = sld [smem:[#allocation7 + $0x9b]]  ;;  %v721_v36 = vstv %s2065_s2 }
  0xcd   : > { %1224 = vtanh.f32 %v718_v16  ;;  %v730_v24 = vadd.f32 %v729_v19, %v726_v18  ;;  %v740_v26 = vstv %s1062_s7  ;;  %s2080_s4 = sld [smem:[#allocation8 + $0x1b]] }
  0xce   : > { %v741_v27 = vmul.f32 %v740_v26, %v1669_v37  ;;  %v743_v29 = vstv %s1063_s13  ;;  %s2083_s23 = sld [smem:[#allocation10 + $0x1a]]  ;;  %v693_v39 = vadd.f32 %v692_v20, %v678_v2 }
  0xcf   : > { %v1223_v31 = vpop.eup %1222  ;;  %v733_v40 = vadd.f32 %v732_v25, %v730_v24  ;;  %v744_v32 = vmul.f32 %v743_v29, %v1799_v42  ;;  %s1070_s24 = sld [smem:[#allocation7 + $0x1c]]  ;;  %v747_v35 = vstv %s2070_s20 }
  0xd0   : > { %v707_v33 = vmul.f32 %v1223_v31, %v706_v12  ;;  %s1071_s3 = sld [smem:[#allocation7 + $0x9c]]  ;;  %v736_v54 = vstv %s2074_s1 }
  0xd1   : > { %1226 = vtanh.f32 %v733_v40  ;;  %v745_v22 = vadd.f32 %v744_v32, %v741_v27  ;;  %v755_v1 = vstv %s1066_s10  ;;  %s2088_s28 = sld [smem:[#allocation8 + $0x1c]] }
  0xd2   : > { %v708_v38 = vadd.f32 %v707_v33, %v693_v39  ;;  %v756_v44 = vmul.f32 %v755_v1, %v1669_v37  ;;  %v758_v23 = vstv %s1067_s16  ;;  %s2091_s30 = sld [smem:[#allocation10 + $0x1b]] }
  0xd3   : > { %v1225_v43 = vpop.eup %1224  ;;  %v748_v45 = vadd.f32 %v747_v35, %v745_v22  ;;  %v759_v41 = vmul.f32 %v758_v23, %v1799_v42  ;;  %s1074_s15 = sld [smem:[#allocation7 + $0x1d]]  ;;  %v762_v53 = vstv %s2080_s4 }
  0xd4   : > { %v722_v46 = vmul.f32 %v1225_v43, %v721_v36  ;;  %s1075_s19 = sld [smem:[#allocation7 + $0x9d]]  ;;  %v751_v60 = vstv %s2083_s23 }
  0xd5   : > { %1228 = vtanh.f32 %v748_v45  ;;  %v760_v58 = vadd.f32 %v759_v41, %v756_v44  ;;  %v770_v0 = vstv %s1070_s24  ;;  %s2096_s11 = sld [smem:[#allocation8 + $0x1d]] }
  0xd6   : > { %v723_v57 = vadd.f32 %v722_v46, %v708_v38  ;;  %v771_v61 = vmul.f32 %v770_v0, %v1669_v37  ;;  %v773_v17 = vstv %s1071_s3  ;;  %s2099_s6 = sld [smem:[#allocation10 + $0x1c]] }
  0xd7   : > { %v1227_v49 = vpop.eup %1226  ;;  %v763_v52 = vadd.f32 %v762_v53, %v760_v58  ;;  %v774_v56 = vmul.f32 %v773_v17, %v1799_v42  ;;  %s1078_s9 = sld [smem:[#allocation7 + $0x1e]]  ;;  %v777_v21 = vstv %s2088_s28 }
  0xd8   : > { %v737_v47 = vmul.f32 %v1227_v49, %v736_v54  ;;  %s1079_s25 = sld [smem:[#allocation7 + $0x9e]]  ;;  %v766_v5 = vstv %s2091_s30 }
  0xd9   : > { %1230 = vtanh.f32 %v763_v52  ;;  %v775_v62 = vadd.f32 %v774_v56, %v771_v61  ;;  %v785_v3 = vstv %s1074_s15  ;;  %s2104_s29 = sld [smem:[#allocation8 + $0x1e]] }
  0xda   : > { %v738_v7 = vadd.f32 %v737_v47, %v723_v57  ;;  %v786_v8 = vmul.f32 %v785_v3, %v1669_v37  ;;  %v788_v11 = vstv %s1075_s19  ;;  %s2107_s27 = sld [smem:[#allocation10 + $0x1d]] }
  0xdb   : > { %v1229_v14 = vpop.eup %1228  ;;  %v778_v28 = vadd.f32 %v777_v21, %v775_v62  ;;  %v789_v48 = vmul.f32 %v788_v11, %v1799_v42  ;;  %s1082_s14 = sld [smem:[#allocation7 + $0x1f]]  ;;  %v792_v55 = vstv %s2096_s11 }
  0xdc   : > { %v752_v51 = vmul.f32 %v1229_v14, %v751_v60  ;;  %s1083_s22 = sld [smem:[#allocation7 + $0x9f]]  ;;  %v781_v15 = vstv %s2099_s6 }
  0xdd   : > { %1232 = vtanh.f32 %v778_v28  ;;  %v790_v6 = vadd.f32 %v789_v48, %v786_v8  ;;  %v800_v10 = vstv %s1078_s9  ;;  %s1084_s26 = sld [smem:[#allocation8 + $0x1f]] }
  0xde   : > { %v753_v13 = vadd.f32 %v752_v51, %v738_v7  ;;  %v801_v50 = vmul.f32 %v800_v10, %v1669_v37  ;;  %v803_v59 = vstv %s1079_s25  ;;  %s1081_s5 = sld [smem:[#allocation10 + $0x1e]] }
  0xdf   : > { %v1231_v30 = vpop.eup %1230  ;;  %v793_v63 = vadd.f32 %v792_v55, %v790_v6  ;;  %v804_v34 = vmul.f32 %v803_v59, %v1799_v42  ;;  %v807_v9 = vstv %s2104_s29  ;;  %s1085_s17 = sld [smem:[#allocation10 + $0x1f]] }
  0xe0   : > { %v767_v4 = vmul.f32 %v1231_v30, %v766_v5  ;;  %v796_v29 = vstv %s2107_s27  ;;  %s2236_s21 = sld [smem:[#allocation20_spill]] }
  0xe1   : > { %1234 = vtanh.f32 %v793_v63  ;;  %v805_v16 = vadd.f32 %v804_v34, %v801_v50  ;;  %v815_v18 = vstv %s1082_s14  ;;  %s2237_s18 = sld [smem:[#allocation25_spill]] }
  0xe2   : > { %v768_v19 = vadd.f32 %v767_v4, %v753_v13  ;;  %v816_v20 = vmul.f32 %v815_v18, %v1669_v37  ;;  %v818_v12 = vstv %s1083_s22  ;;  %s2238_s8 = sld [smem:[#allocation41_spill]] }
  0xe3   : > { %v1233_v25 = vpop.eup %1232  ;;  %v808_v2 = vadd.f32 %v807_v9, %v805_v16  ;;  %v819_v24 = vmul.f32 %v818_v12, %v1799_v42  ;;  %v822_v27 = vstv %s1084_s26 }
  0xe4   : > { %v782_v26 = vmul.f32 %v1233_v25, %v781_v15  ;;  %v811_v35 = vstv %s1081_s5 }
  0xe5   : > { %1236 = vtanh.f32 %v808_v2  ;;  %v820_v31 = vadd.f32 %v819_v24, %v816_v20  ;;  %v826_v1 = vstv %s1085_s17 }
  0xe6   : > { %v783_v39 = vadd.f32 %v782_v26, %v768_v19 }
  0xe7   : > { %v1235_v40 = vpop.eup %1234  ;;  %v823_v32 = vadd.f32 %v822_v27, %v820_v31  ;;  %s280_s13 = scalar_lea.vmem [#allocation11], %s2237_s18  ;;  %s835_s10 = scalar_lea.sflag [#allocation5], %s2237_s18 }
  0xe8   : > { %v797_v33 = vmul.f32 %v1235_v40, %v796_v29  ;;  %s843_s7 = scalar_lea.hbm %s2238_s8, %s2236_s21  ;;  %s845_s20 = sshll.u32 %s280_s13, 4  ;;  %s846_s20 = int_to_ptr.vmem [resolvable:$true] %s845_s20 }
  0xe9   : > { %1238 = vtanh.f32 %v823_v32  ;;  %s847_s1 = sshll.u32 %s843_s7, 4  ;;  %s1337_s3 = scalar_lea.hbm %s2238_s8, 2  ;;  %s848_s1 = int_to_ptr.hbm [resolvable:$true] %s847_s1 }
  0xea   : > { %v798_v37 = vadd.f32 %v797_v33, %v783_v39  ;;  %s1331_s16 = sshra.s32 %s848_s1, 4  ;;  %s1332_s16 = int_to_ptr.hbm [resolvable:$true] %s1331_s16 }
  0xeb   : > { %v1237_v36 = vpop.eup %1236  ;;  %s1333_s4 = scalar_lea.hbm %s1332_s16, 1  ;;  %p1338_p9 = scmp.lt.s32.totalorder %s1332_s16, %s2238_s8 }
  0xec   : > { %v812_v22 = vmul.f32 %v1237_v36, %v811_v35  ;;  %p1334_p1 = scmp.ne.s32.totalorder %s1332_s16, %s1333_s4  ;;  %p1339_p10 = scmp.lt.s32.totalorder %s1337_s3, %s1333_s4 }
  0xee   : > { %v813_v38 = vadd.f32 %v812_v22, %v798_v37  ;;  %p1335_p4 = pnand %p1334_p1, %p1504_p3  ;;  %p1340_p2 = por %p1339_p10, %p1338_p9 }
  0xef   : > { %v1239_v42 = vpop.eup %1238 }
  0xf0   : > { %v827_v44 = vmul.f32 %v1239_v42, %v826_v1  ;;  %p1336_p8 = pneg %p1335_p4 }
  0xf2   : > { %v828_v23 = vadd.f32 %v827_v44, %v813_v38  ;;  %p1341_p11 = pnand %p1340_p2, %p1336_p8 }
  0xf4   : > { %v829_v43 = vmul.f32 0.5, %v828_v23 }
  0xf6   : > { %1240 = vtanh.f32 %v829_v43 }
  0xfc   : > { %v1241_v45 = vpop.eup %1240 }
  0xfd   : > { %v831_v41 = vadd.f32 1.0, %v1241_v45 }
  0xff   : > { %v832_v46 = vmul.f32 0.5, %v831_v41 }
 0x101   : > { %833 = vst [vmem:[%s280_s13] sm:$0x1] %v832_v46 }
 0x102   : > { %1344 = shalt.err (!%p1341_p11)
}
 0x103   : > { %1102 = dma.vmem_to_hbm [thread:$0]  (%p1504_p3), %s846_s20, 16, %s848_s1, %s835_s10  }
 0x104 PF: > { %s2240_s15 = sld [smem:[#allocation16_spill]] }
 0x105   : > { %s2242_s11 = sld [smem:[#allocation19_spill]] }
 0x10a   : > { %s859_s6 = sand.u32 1, %s2240_s15  }
 0x10b   : > { %p2243_p12 = scmp.ge.s32.totalorder %s2242_s11, 2  ;;  %s860_s9 = scalar_lea.sflag [#allocation5], %s859_s6 }
 0x10d   : > { %p1119_p13 = pnand %p2243_p12, %p1467_p6 }
 0x10f   : > { %p1120_p0 = pneg %p1119_p13 }
 0x111   : > { %1374 = dma.done.wait (%p1120_p0), %s860_s9, 16  }
 0x112   : > { %1376 = vsyncadd (%p1120_p0), %s860_s9, 4294967280  ;;  %s2244_s23 = sld [smem:[#allocation22_spill]] }
 0x113   : > { %s2245_s20 = sld [smem:[#allocation17_spill]] }
 0x114   : > { %s2246_s21 = sld [smem:[#allocation18_spill]] }
 0x115   : > { %s2247_s22 = sld [smem:[#allocation23_spill]] }
 0x118   : > { %p21_p5 = scmp.ge.s32.totalorder %s2244_s23, 4  }
 0x11a   :  { %23 = sbr.rel (!%p21_p5) target bundleno = 14 (0xe), region = 98 }
 0x11f   :  { %865 = vsyncpa [#allocation4], 1 }
 0x120   :  { %867 = vsyncpa [#allocation4 + $0x1], 1 }
 0x121   :  { %868 = vsyncpa [#allocation5], 1 }
 0x122   :  { %870 = vsyncpa [#allocation5 + $0x1], 1 }
 0x123   :  { %871 = vsyncpa [#allocation6], 1 }
 0x124   :  { %873 = vsyncpa [#allocation6 + $0x1], 1 }
 0x125   :  { %874 = vsyncpa [#allocation9], 1 }

</bundles_post_ra>
